<compile_context>
chip_gen: v7x
topology: tpu7x:2x2x1
jax: 0.10.0
libtpu: 0.0.40
codegen_flags: <defaults>
</compile_context>

<pallas_src>
import jax
import jax.numpy as jnp
import numpy as np
from jax.experimental import pallas as pl
from jax.experimental.pallas import tpu as pltpu

# ----------------------------- model sizes (small demo) ------------------------------
BATCH = 2
N_NODES = 12           # num_nodes   (graph size; channels of the temporal convs)
T_STEPS = 8            # num_timesteps (temporal length; D-GCN input feature size)
HID_T, RANK_T = 16, 4
HID_S, RANK_S = 16, 4
KSIZE = 3
ORD1, ORD2, ORD3 = 3, 2, 2        # Chebyshev orders of SC1 / SC2 / SC3
LV = T_STEPS - KSIZE + 1          # valid conv length per direction
SLAB_W = 32                       # lane width of the packed constant slab (max block width)


# ----------------------------- fused kernel (built around static slab offsets) --------
def _make_kernel(idx, batch):
    BT = batch * T_STEPS
    f32 = jnp.float32

    def get(ref, name):
        r0, nr, nc = idx[name]
        return ref[r0:r0 + nr, 0:nc]

    def _sigmoid(v):
        # EUP approx reciprocal + one Newton step -> f32-accurate, no VPU divide sequence.
        d = 1.0 + jnp.exp(-jnp.maximum(v, -30.0))   # clamp keeps d finite (Newton NaN-safe)
        r = pl.reciprocal(d, approx=True)
        return r * (2.0 - d * r)

    def _softplus(v):
        return jnp.maximum(v, 0.0) + jnp.log(1.0 + jnp.exp(-jnp.abs(v)))

    def kernel(x_ref, w_ref, out_ref):
        x = x_ref[...]                                        # (N, B*T), batch-major columns

        s1 = get(w_ref, "S1")                                 # (BT,BT) column shift-by-1
        s2 = get(w_ref, "S2")                                 # column shift-by-2
        rsh = get(w_ref, "R")                                 # shift-right-by-(K-1)
        vrow = get(w_ref, "valid")                            # (1,BT) 0/1: t_in_batch < LV

        # ---------------- temporal branch: TC1 -> TC2 -> TC3 -> TNB ------------------
        # channels-first, batch folded into columns; conv taps applied via shift matmuls.
        def btcn(h, name, c_out):
            wt = get(w_ref, name + "_w")                      # (K*6*c_out, c_in) tap-stacked
            bb = get(w_ref, name + "_b")                      # (6*c_out, 1)
            g = 6 * c_out
            p_all = jnp.dot(wt, h, preferred_element_type=f32)        # per-tap partials
            m = (p_all[0:g]
                 + jnp.dot(p_all[g:2 * g], s1, preferred_element_type=f32)
                 + jnp.dot(p_all[2 * g:3 * g], s2, preferred_element_type=f32)) + bb
            fwd = jnp.maximum(m[0:c_out] * _sigmoid(m[c_out:2 * c_out])
                              + m[2 * c_out:3 * c_out], 0.0)
            bwd = jnp.maximum(m[3 * c_out:4 * c_out] * _sigmoid(m[4 * c_out:5 * c_out])
                              + m[5 * c_out:6 * c_out], 0.0)   # backward taps pre-reversed
            fwd = fwd * vrow
            bwd = bwd * vrow
            # backward output lives at t+K-1: apply the right-shift matrix (exact 0/1 matmul)
            return fwd + jnp.dot(bwd, rsh, preferred_element_type=f32)   # (c_out, B*T)

        h = btcn(x, "tc1", HID_T)
        h = btcn(h, "tc2", RANK_T)
        h = btcn(h, "tc3", HID_T)
        mt = (jnp.dot(get(w_ref, "tnb_w"), h, preferred_element_type=f32)
              + get(w_ref, "tnb_b"))                          # (2N, B*T): [n_raw ; p_raw]

        # ---------------- spatial branch: SC1 -> SC2 -> SC3 -> SNB -------------------
        # Chebyshev-style operators G_m precomputed host-side -> independent matmuls only.
        def dgcn(s, name, order):
            acc = jnp.dot(s, get(w_ref, f"{name}_th0"), preferred_element_type=f32)
            for m_i in range(1, 2 * order + 1):
                fm = jnp.dot(get(w_ref, f"{name}_g{m_i}"), s, preferred_element_type=f32)
                acc = acc + jnp.dot(fm, get(w_ref, f"{name}_th{m_i}"),
                                    preferred_element_type=f32)
            return jnp.maximum(acc + get(w_ref, f"{name}_b"), 0.0)

        s = dgcn(x, "sc1", ORD1)                              # (N, B*HID_S)
        s = dgcn(s, "sc2", ORD2)                              # (N, B*RANK_S)
        s = dgcn(s, "sc3", ORD3)                              # (N, B*HID_S)
        sm = (jnp.dot(s, get(w_ref, "snb_w"), preferred_element_type=f32)
              + get(w_ref, "snb_b"))                          # (N, 2*B*T): [n_raw | p_raw]

        # ---------------- combine (single merged store) -------------------------------
        n_out = _softplus(mt[0:N_NODES]) * _softplus(sm[:, 0:BT])
        p_out = _sigmoid(mt[N_NODES:2 * N_NODES]) * _sigmoid(sm[:, BT:2 * BT])
        out_ref[...] = jnp.concatenate([n_out, p_out], axis=0)   # (2N, B*T)

    return kernel


# ----------------------------- one-time host-side constant packing --------------------
def pack_constants(params, A_q, A_h, batch):
    """Fold every weight / bias / graph operator / structural constant of the forward pass
    into ONE f32 slab (rows, SLAB_W) plus a dict of static (row_offset, rows, cols)."""
    Aq = np.asarray(A_q, np.float32)
    Ah = np.asarray(A_h, np.float32)
    BT = batch * T_STEPS

    entries = []

    def add(name, arr):
        arr = np.asarray(arr, np.float32)
        assert arr.ndim == 2 and arr.shape[1] <= SLAB_W, (name, arr.shape)
        entries.append((name, arr))

    # --- B_TCN layers: tap-stacked gate weights; backward taps pre-reversed ---
    def pack_tcn(name, p, c_in):
        def tap(key, k):
            w = np.asarray(p[key], np.float32)          # (c_in*K, c_out), tap-major rows
            return w[k * c_in:(k + 1) * c_in, :].T      # (c_out, c_in)
        blocks = []
        for k in range(KSIZE):
            blocks += [tap("w1", k), tap("w2", k), tap("w3", k),
                       tap("w1b", KSIZE - 1 - k), tap("w2b", KSIZE - 1 - k),
                       tap("w3b", KSIZE - 1 - k)]
        add(name + "_w", np.concatenate(blocks, axis=0))        # (K*6*c_out, c_in)
        add(name + "_b", np.concatenate(
            [np.asarray(p[n], np.float32)
             for n in ("b1", "b2", "b3", "b1b", "b2b", "b3b")])[:, None])

    pack_tcn("tc1", params["TC1"], N_NODES)
    pack_tcn("tc2", params["TC2"], HID_T)
    pack_tcn("tc3", params["TC3"], RANK_T)

    # --- temporal NB head (channels-first) ---
    tnb = params["TNB"]
    add("tnb_w", np.concatenate([np.asarray(tnb["wn"], np.float32).T,
                                 np.asarray(tnb["wp"], np.float32).T], axis=0))
    add("tnb_b", np.concatenate([np.asarray(tnb["bn"], np.float32),
                                 np.asarray(tnb["bp"], np.float32)])[:, None])

    # --- structural constants: column-shift matrices + validity mask (batch-major cols) ---
    S1 = np.zeros((BT, BT), np.float32)
    S2 = np.zeros((BT, BT), np.float32)
    R = np.zeros((BT, BT), np.float32)
    for j in range(BT):
        if j + 1 < BT:
            S1[j + 1, j] = 1.0          # (P @ S1)[:, j] = P[:, j+1]
        if j + 2 < BT:
            S2[j + 2, j] = 1.0          # (P @ S2)[:, j] = P[:, j+2]
        if j + KSIZE - 1 < BT:
            R[j, j + KSIZE - 1] = 1.0   # (Q @ R)[:, j] = Q[:, j-(K-1)]
    add("S1", S1)
    add("S2", S2)
    add("R", R)
    add("valid", (np.arange(BT) % T_STEPS < LV).astype(np.float32)[None, :])

    # --- D_GCN layers: precomputed Chebyshev operators + block-diagonal thetas ---
    def cheb(A, d):
        mats = []
        if d >= 1:
            mats.append(A.copy())
        tkm2, tkm1 = np.eye(A.shape[0], dtype=np.float32), A
        for _ in range(2, d + 1):
            tk = 2.0 * (A @ tkm1) - tkm2
            mats.append(tk)
            tkm2, tkm1 = tkm1, tk
        return mats                                             # [T_1 .. T_d]

    def pack_dgcn(name, p, c_in, c_out, d):
        cq = cheb(Aq, d)
        ch = cheb(Ah, d)
        # PyTorch D_GCN rebinds x0/x1 inside the loop, so the second support's features are
        # T_j(A_h) applied to T_{d-1}(A_q) X (not to X).  Reproduce that exactly.
        base = np.eye(N_NODES, dtype=np.float32) if d == 1 else cq[d - 2]
        gmats = cq + [M @ base for M in ch]                     # 2d operators, reference order
        for m_i, G in enumerate(gmats, start=1):
            add(f"{name}_g{m_i}", G)
        nm = 2 * d + 1
        theta = np.asarray(p["theta"], np.float32).reshape(c_in, nm, c_out)
        eye_b = np.eye(batch, dtype=np.float32)
        for m_i in range(nm):
            add(f"{name}_th{m_i}", np.kron(eye_b, theta[:, m_i, :]))   # (B*c_in, B*c_out)
        add(f"{name}_b", np.tile(np.asarray(p["bias"], np.float32), batch)[None, :])

    pack_dgcn("sc1", params["SC1"], T_STEPS, HID_S, ORD1)
    pack_dgcn("sc2", params["SC2"], HID_S, RANK_S, ORD2)
    pack_dgcn("sc3", params["SC3"], RANK_S, HID_S, ORD3)

    # --- spatial NB head: block-diag [wn | wp]; output columns = [n(B*T) | p(B*T)] ---
    snb = params["SNB"]
    wn = np.asarray(snb["wn"], np.float32)
    wp = np.asarray(snb["wp"], np.float32)
    Ws = np.zeros((batch * HID_S, 2 * BT), np.float32)
    for b in range(batch):
        Ws[b * HID_S:(b + 1) * HID_S, b * T_STEPS:(b + 1) * T_STEPS] = wn
        Ws[b * HID_S:(b + 1) * HID_S, BT + b * T_STEPS:BT + (b + 1) * T_STEPS] = wp
    add("snb_w", Ws)
    add("snb_b", np.concatenate([np.tile(np.asarray(snb["bn"], np.float32), batch),
                                 np.tile(np.asarray(snb["bp"], np.float32), batch)])[None, :])

    # --- assemble slab (each entry padded to an 8-row boundary -> aligned static slices) ---
    idx = {}
    blocks = []
    r = 0
    for name, arr in entries:
        nr, nc = arr.shape
        pr = (-nr) % 8
        blk = np.zeros((nr + pr, SLAB_W), np.float32)
        blk[:nr, :nc] = arr
        idx[name] = (r, nr, nc)
        blocks.append(blk)
        r += nr + pr
    slab = np.concatenate(blocks, axis=0)
    return jnp.asarray(slab), idx


# ----------------------------- fused forward (one gridless pallas_call) ---------------
def make_forward(idx, batch):
    kernel = _make_kernel(idx, batch)
    BT = batch * T_STEPS

    @jax.jit
    def forward(X4, slab):
        """ST_NB.forward.  X4: (B, num_nodes, num_timesteps, 1) -> (n_res, p_res)."""
        X = X4[..., 0].astype(jnp.float32)                           # (B, N, T)
        x2d = jnp.transpose(X, (1, 0, 2)).reshape(N_NODES, BT)       # (N, B*T) batch-major cols
        out = pl.pallas_call(
            kernel,
            out_shape=jax.ShapeDtypeStruct((2 * N_NODES, BT), jnp.float32),
            # gridless: whole-array VMEM blocks, no pipeline double-buffering of weights
            compiler_params=pltpu.CompilerParams(vmem_limit_bytes=8 * 1024 * 1024),
        )(x2d, slab)
        out3 = out.reshape(2 * N_NODES, batch, T_STEPS)
        n_res = jnp.transpose(out3[:N_NODES], (1, 0, 2))             # (B, N, T)
        p_res = jnp.transpose(out3[N_NODES:], (1, 0, 2))
        return n_res, p_res

    return forward


# ----------------------------- pure-JAX reference (unfused, PyTorch-faithful) ---------
def _ref_gated(x, w1, w2, w3, b1, b2, b3):
    m1 = x @ w1 + b1[None, :]
    m2 = x @ w2 + b2[None, :]
    m3 = x @ w3 + b3[None, :]
    return jnp.maximum(m1 * jax.nn.sigmoid(m2) + m3, 0.0)


def _ref_btcn(X, p, k=KSIZE):
    B, L, c_in = X.shape
    c_out = p["w1"].shape[1]
    lv = L - k + 1

    def im2col(Xcl):
        return jnp.concatenate([Xcl[:, j:j + lv, :] for j in range(k)],
                               axis=-1).reshape(B * lv, c_in * k)

    outf = _ref_gated(im2col(X), p["w1"], p["w2"], p["w3"],
                      p["b1"], p["b2"], p["b3"]).reshape(B, lv, c_out)
    Xb = X[:, ::-1, :]
    outb = _ref_gated(im2col(Xb), p["w1b"], p["w2b"], p["w3b"],
                      p["b1b"], p["b2b"], p["b3b"]).reshape(B, lv, c_out)
    pad = jnp.zeros((B, k - 1, c_out), jnp.float32)
    outf = jnp.concatenate([outf, pad], axis=1)
    outb = jnp.concatenate([outb, pad], axis=1)[:, ::-1, :]
    return outf + outb


def _ref_dgcn(X, A_q, A_h, theta, bias, orders):
    B, N, in_size = X.shape
    nm = 2 * orders + 1
    x0 = jnp.transpose(X, (1, 2, 0)).reshape(N, in_size * B)
    feats = [x0]
    for support in (A_q, A_h):
        x1 = support @ x0
        feats.append(x1)
        for _ in range(2, orders + 1):
            x2 = 2.0 * (support @ x1) - x0
            feats.append(x2)
            x1, x0 = x2, x1
    x = jnp.stack(feats, 0).reshape(nm, N, in_size, B)
    x = jnp.transpose(x, (3, 1, 2, 0)).reshape(B * N, in_size * nm)
    out = jnp.maximum(x @ theta + bias[None, :], 0.0)
    return out.reshape(B, N, theta.shape[1])


def _ref_nbnorm(X3, p):
    B, L, c_in = X3.shape
    c_out = p["wn"].shape[1]
    x = X3.reshape(B * L, c_in)
    n = jax.nn.softplus(x @ p["wn"] + p["bn"][None, :])
    pp = jax.nn.sigmoid(x @ p["wp"] + p["bp"][None, :])
    return n.reshape(B, L, c_out), pp.reshape(B, L, c_out)


def st_nb_reference(X4, A_q, A_h, params):
    X = X4[..., 0]                                # (B, N, T)
    X_T = jnp.transpose(X, (0, 2, 1))             # (B, T, N)
    h = _ref_btcn(X_T, params["TC1"])
    h = _ref_btcn(h, params["TC2"])
    h = _ref_btcn(h, params["TC3"])
    n_t, p_t = _ref_nbnorm(h, params["TNB"])      # (B, T, N)
    s = _ref_dgcn(X, A_q, A_h, params["SC1"]["theta"], params["SC1"]["bias"], params["SC1"]["orders"])
    s = _ref_dgcn(s, A_q, A_h, params["SC2"]["theta"], params["SC2"]["bias"], params["SC2"]["orders"])
    s = _ref_dgcn(s, A_q, A_h, params["SC3"]["theta"], params["SC3"]["bias"], params["SC3"]["orders"])
    n_s, p_s = _ref_nbnorm(s, params["SNB"])      # (B, N, T)
    n_res = jnp.transpose(n_t, (0, 2, 1)) * n_s
    p_res = jnp.transpose(p_t, (0, 2, 1)) * p_s
    return n_res, p_res


# ----------------------------- deterministic parameter init --------------------------
def init_params(key):
    keys = iter(jax.random.split(key, 64))

    def uni(shape, scale):
        return jax.random.uniform(next(keys), shape, jnp.float32, -scale, scale)

    def tcn(c_in, c_out, k=KSIZE):
        s = 1.0 / np.sqrt(c_in * k)
        return dict(
            w1=uni((c_in * k, c_out), s), w2=uni((c_in * k, c_out), s), w3=uni((c_in * k, c_out), s),
            w1b=uni((c_in * k, c_out), s), w2b=uni((c_in * k, c_out), s), w3b=uni((c_in * k, c_out), s),
            b1=uni((c_out,), s), b2=uni((c_out,), s), b3=uni((c_out,), s),
            b1b=uni((c_out,), s), b2b=uni((c_out,), s), b3b=uni((c_out,), s))

    def dgcn(c_in, c_out, orders):
        nm = 2 * orders + 1
        s = 1.0 / np.sqrt(c_out)
        return dict(theta=uni((c_in * nm, c_out), s), bias=uni((c_out,), s), orders=orders)

    def nb(c_in, c_out):
        s = 1.0 / np.sqrt(c_in)
        return dict(wn=uni((c_in, c_out), s), bn=uni((c_out,), s),
                    wp=uni((c_in, c_out), s), bp=uni((c_out,), s))

    return dict(
        TC1=tcn(N_NODES, HID_T), TC2=tcn(HID_T, RANK_T), TC3=tcn(RANK_T, HID_T),
        TNB=nb(HID_T, N_NODES),
        SC1=dgcn(T_STEPS, HID_S, ORD1), SC2=dgcn(HID_S, RANK_S, ORD2), SC3=dgcn(RANK_S, HID_S, ORD3),
        SNB=nb(HID_S, T_STEPS))


# ----------------------------- main ---------------------------------------------------
if __name__ == "__main__":
    key = jax.random.PRNGKey(0)
    kx, ka, kh, kp = jax.random.split(key, 4)

    X = jax.random.uniform(kx, (BATCH, N_NODES, T_STEPS, 1), jnp.float32)
    A = jax.random.uniform(ka, (N_NODES, N_NODES), jnp.float32)
    A_q = A / jnp.sum(A, axis=1, keepdims=True)      # forward random-walk matrix
    Ah_raw = jax.random.uniform(kh, (N_NODES, N_NODES), jnp.float32)
    A_h = Ah_raw / jnp.sum(Ah_raw, axis=1, keepdims=True)   # backward random-walk matrix

    params = init_params(kp)
    slab, idx = pack_constants(params, A_q, A_h, BATCH)     # one-time host-side packing
    st_nb_forward = make_forward(idx, BATCH)

    n_res, p_res = st_nb_forward(X, slab)
    jax.block_until_ready((n_res, p_res))

    # correctness check against an unfused pure-JAX reference of the same forward pass
    # (tolerance slightly widened vs f32-exact: approx-reciprocal sigmoid + host-side
    #  Chebyshev operator precompute reorder a handful of f32 roundings)
    n_ref, p_ref = st_nb_reference(X, A_q, A_h, params)
    np.testing.assert_allclose(np.asarray(n_res), np.asarray(n_ref), rtol=3e-3, atol=5e-4)
    np.testing.assert_allclose(np.asarray(p_res), np.asarray(p_ref), rtol=3e-3, atol=5e-4)
    assert n_res.shape == (BATCH, N_NODES, T_STEPS)
    assert p_res.shape == (BATCH, N_NODES, T_STEPS)

    print("KERNEL_OK")
</pallas_src>

<mosaic_0001>
module attributes {stable_mosaic.version = 11 : i64} {
  func.func @kernel(%arg0: memref<12x16xf32, #tpu.memory_space<vmem>>, %arg1: memref<1568x32xf32, #tpu.memory_space<vmem>>, %arg2: memref<24x16xf32, #tpu.memory_space<vmem>>) attributes {dimension_semantics = [], scalar_prefetch = 0 : i64, scratch_operands = 0 : i64, tpu.core_type = #tpu.core_type<tc>} {
    %c0 = arith.constant 0 : index
    %c0_0 = arith.constant 0 : index
    %0 = vector.load %arg0[%c0, %c0_0] : memref<12x16xf32, #tpu.memory_space<vmem>>, vector<12x16xf32>
    %c912 = arith.constant 912 : index
    %c0_1 = arith.constant 0 : index
    %1 = vector.load %arg1[%c912, %c0_1] : memref<1568x32xf32, #tpu.memory_space<vmem>>, vector<16x16xf32>
    %c928 = arith.constant 928 : index
    %c0_2 = arith.constant 0 : index
    %2 = vector.load %arg1[%c928, %c0_2] : memref<1568x32xf32, #tpu.memory_space<vmem>>, vector<16x16xf32>
    %c944 = arith.constant 944 : index
    %c0_3 = arith.constant 0 : index
    %3 = vector.load %arg1[%c944, %c0_3] : memref<1568x32xf32, #tpu.memory_space<vmem>>, vector<16x16xf32>
    %c960 = arith.constant 960 : index
    %c0_4 = arith.constant 0 : index
    %4 = vector.load %arg1[%c960, %c0_4] : memref<1568x32xf32, #tpu.memory_space<vmem>>, vector<1x16xf32>
    %c0_5 = arith.constant 0 : index
    %c0_6 = arith.constant 0 : index
    %5 = vector.load %arg1[%c0_5, %c0_6] : memref<1568x32xf32, #tpu.memory_space<vmem>>, vector<288x12xf32>
    %c288 = arith.constant 288 : index
    %c0_7 = arith.constant 0 : index
    %6 = vector.load %arg1[%c288, %c0_7] : memref<1568x32xf32, #tpu.memory_space<vmem>>, vector<96x1xf32>
    %cst = arith.constant dense<0.000000e+00> : vector<288x16xf32>
    %7 = tpu.matmul %5, %0, %cst {dimension_numbers = #tpu.dot_dimension_numbers<[1], [0], [0], [1], [0, 0, 1, 1], [], []>} : vector<288x12xf32>, vector<12x16xf32>, vector<288x16xf32> -> vector<288x16xf32>
    %8 = vector.extract_strided_slice %7 {offsets = [0, 0], sizes = [96, 16], strides = [1, 1]} : vector<288x16xf32> to vector<96x16xf32>
    %9 = vector.extract_strided_slice %7 {offsets = [96, 0], sizes = [96, 16], strides = [1, 1]} : vector<288x16xf32> to vector<96x16xf32>
    %cst_8 = arith.constant dense<0.000000e+00> : vector<96x16xf32>
    %10 = tpu.matmul %9, %1, %cst_8 {dimension_numbers = #tpu.dot_dimension_numbers<[1], [0], [0], [1], [0, 0, 1, 1], [], []>} : vector<96x16xf32>, vector<16x16xf32>, vector<96x16xf32> -> vector<96x16xf32>
    %11 = arith.addf %8, %10 : vector<96x16xf32>
    %12 = vector.extract_strided_slice %7 {offsets = [192, 0], sizes = [96, 16], strides = [1, 1]} : vector<288x16xf32> to vector<96x16xf32>
    %cst_9 = arith.constant dense<0.000000e+00> : vector<96x16xf32>
    %13 = tpu.matmul %12, %2, %cst_9 {dimension_numbers = #tpu.dot_dimension_numbers<[1], [0], [0], [1], [0, 0, 1, 1], [], []>} : vector<96x16xf32>, vector<16x16xf32>, vector<96x16xf32> -> vector<96x16xf32>
    %14 = arith.addf %11, %13 : vector<96x16xf32>
    %15 = vector.broadcast %6 : vector<96x1xf32> to vector<96x16xf32>
    %16 = arith.addf %14, %15 : vector<96x16xf32>
    %17 = vector.extract_strided_slice %16 {offsets = [0, 0], sizes = [16, 16], strides = [1, 1]} : vector<96x16xf32> to vector<16x16xf32>
    %18 = vector.extract_strided_slice %16 {offsets = [16, 0], sizes = [16, 16], strides = [1, 1]} : vector<96x16xf32> to vector<16x16xf32>
    %cst_10 = arith.constant -3.000000e+01 : f32
    %19 = vector.broadcast %cst_10 : f32 to vector<16x16xf32>
    %20 = arith.maximumf %18, %19 : vector<16x16xf32>
    %cst_11 = arith.constant 0.000000e+00 : f32
    %21 = vector.broadcast %cst_11 : f32 to vector<16x16xf32>
    %22 = arith.subf %21, %20 : vector<16x16xf32>
    %23 = math.exp %22 : vector<16x16xf32>
    %cst_12 = arith.constant 1.000000e+00 : f32
    %24 = vector.broadcast %cst_12 : f32 to vector<16x16xf32>
    %25 = arith.addf %24, %23 : vector<16x16xf32>
    %26 = tpu.reciprocal %25 {approx = true} : vector<16x16xf32> -> vector<16x16xf32>
    %27 = arith.mulf %25, %26 : vector<16x16xf32>
    %cst_13 = arith.constant 2.000000e+00 : f32
    %28 = vector.broadcast %cst_13 : f32 to vector<16x16xf32>
    %29 = arith.subf %28, %27 : vector<16x16xf32>
    %30 = arith.mulf %26, %29 : vector<16x16xf32>
    %31 = arith.mulf %17, %30 : vector<16x16xf32>
    %32 = vector.extract_strided_slice %16 {offsets = [32, 0], sizes = [16, 16], strides = [1, 1]} : vector<96x16xf32> to vector<16x16xf32>
    %33 = arith.addf %31, %32 : vector<16x16xf32>
    %cst_14 = arith.constant 0.000000e+00 : f32
    %34 = vector.broadcast %cst_14 : f32 to vector<16x16xf32>
    %35 = arith.maximumf %33, %34 : vector<16x16xf32>
    %36 = vector.extract_strided_slice %16 {offsets = [48, 0], sizes = [16, 16], strides = [1, 1]} : vector<96x16xf32> to vector<16x16xf32>
    %37 = vector.extract_strided_slice %16 {offsets = [64, 0], sizes = [16, 16], strides = [1, 1]} : vector<96x16xf32> to vector<16x16xf32>
    %cst_15 = arith.constant -3.000000e+01 : f32
    %38 = vector.broadcast %cst_15 : f32 to vector<16x16xf32>
    %39 = arith.maximumf %37, %38 : vector<16x16xf32>
    %cst_16 = arith.constant 0.000000e+00 : f32
    %40 = vector.broadcast %cst_16 : f32 to vector<16x16xf32>
    %41 = arith.subf %40, %39 : vector<16x16xf32>
    %42 = math.exp %41 : vector<16x16xf32>
    %cst_17 = arith.constant 1.000000e+00 : f32
    %43 = vector.broadcast %cst_17 : f32 to vector<16x16xf32>
    %44 = arith.addf %43, %42 : vector<16x16xf32>
    %45 = tpu.reciprocal %44 {approx = true} : vector<16x16xf32> -> vector<16x16xf32>
    %46 = arith.mulf %44, %45 : vector<16x16xf32>
    %cst_18 = arith.constant 2.000000e+00 : f32
    %47 = vector.broadcast %cst_18 : f32 to vector<16x16xf32>
    %48 = arith.subf %47, %46 : vector<16x16xf32>
    %49 = arith.mulf %45, %48 : vector<16x16xf32>
    %50 = arith.mulf %36, %49 : vector<16x16xf32>
    %51 = vector.extract_strided_slice %16 {offsets = [80, 0], sizes = [16, 16], strides = [1, 1]} : vector<96x16xf32> to vector<16x16xf32>
    %52 = arith.addf %50, %51 : vector<16x16xf32>
    %cst_19 = arith.constant 0.000000e+00 : f32
    %53 = vector.broadcast %cst_19 : f32 to vector<16x16xf32>
    %54 = arith.maximumf %52, %53 : vector<16x16xf32>
    %55 = vector.broadcast %4 : vector<1x16xf32> to vector<16x16xf32>
    %56 = arith.mulf %35, %55 : vector<16x16xf32>
    %57 = vector.broadcast %4 : vector<1x16xf32> to vector<16x16xf32>
    %58 = arith.mulf %54, %57 : vector<16x16xf32>
    %cst_20 = arith.constant dense<0.000000e+00> : vector<16x16xf32>
    %59 = tpu.matmul %58, %3, %cst_20 {dimension_numbers = #tpu.dot_dimension_numbers<[1], [0], [0], [1], [0, 0, 1, 1], [], []>} : vector<16x16xf32>, vector<16x16xf32>, vector<16x16xf32> -> vector<16x16xf32>
    %60 = arith.addf %56, %59 : vector<16x16xf32>
    %c384 = arith.constant 384 : index
    %c0_21 = arith.constant 0 : index
    %61 = vector.load %arg1[%c384, %c0_21] : memref<1568x32xf32, #tpu.memory_space<vmem>>, vector<72x16xf32>
    %c456 = arith.constant 456 : index
    %c0_22 = arith.constant 0 : index
    %62 = vector.load %arg1[%c456, %c0_22] : memref<1568x32xf32, #tpu.memory_space<vmem>>, vector<24x1xf32>
    %cst_23 = arith.constant dense<0.000000e+00> : vector<72x16xf32>
    %63 = tpu.matmul %61, %60, %cst_23 {dimension_numbers = #tpu.dot_dimension_numbers<[1], [0], [0], [1], [0, 0, 1, 1], [], []>} : vector<72x16xf32>, vector<16x16xf32>, vector<72x16xf32> -> vector<72x16xf32>
    %64 = vector.extract_strided_slice %63 {offsets = [0, 0], sizes = [24, 16], strides = [1, 1]} : vector<72x16xf32> to vector<24x16xf32>
    %65 = vector.extract_strided_slice %63 {offsets = [24, 0], sizes = [24, 16], strides = [1, 1]} : vector<72x16xf32> to vector<24x16xf32>
    %cst_24 = arith.constant dense<0.000000e+00> : vector<24x16xf32>
    %66 = tpu.matmul %65, %1, %cst_24 {dimension_numbers = #tpu.dot_dimension_numbers<[1], [0], [0], [1], [0, 0, 1, 1], [], []>} : vector<24x16xf32>, vector<16x16xf32>, vector<24x16xf32> -> vector<24x16xf32>
    %67 = arith.addf %64, %66 : vector<24x16xf32>
    %68 = vector.extract_strided_slice %63 {offsets = [48, 0], sizes = [24, 16], strides = [1, 1]} : vector<72x16xf32> to vector<24x16xf32>
    %cst_25 = arith.constant dense<0.000000e+00> : vector<24x16xf32>
    %69 = tpu.matmul %68, %2, %cst_25 {dimension_numbers = #tpu.dot_dimension_numbers<[1], [0], [0], [1], [0, 0, 1, 1], [], []>} : vector<24x16xf32>, vector<16x16xf32>, vector<24x16xf32> -> vector<24x16xf32>
    %70 = arith.addf %67, %69 : vector<24x16xf32>
    %71 = vector.broadcast %62 : vector<24x1xf32> to vector<24x16xf32>
    %72 = arith.addf %70, %71 : vector<24x16xf32>
    %73 = vector.extract_strided_slice %72 {offsets = [0, 0], sizes = [4, 16], strides = [1, 1]} : vector<24x16xf32> to vector<4x16xf32>
    %74 = vector.extract_strided_slice %72 {offsets = [4, 0], sizes = [4, 16], strides = [1, 1]} : vector<24x16xf32> to vector<4x16xf32>
    %cst_26 = arith.constant -3.000000e+01 : f32
    %75 = vector.broadcast %cst_26 : f32 to vector<4x16xf32>
    %76 = arith.maximumf %74, %75 : vector<4x16xf32>
    %cst_27 = arith.constant 0.000000e+00 : f32
    %77 = vector.broadcast %cst_27 : f32 to vector<4x16xf32>
    %78 = arith.subf %77, %76 : vector<4x16xf32>
    %79 = math.exp %78 : vector<4x16xf32>
    %cst_28 = arith.constant 1.000000e+00 : f32
    %80 = vector.broadcast %cst_28 : f32 to vector<4x16xf32>
    %81 = arith.addf %80, %79 : vector<4x16xf32>
    %82 = tpu.reciprocal %81 {approx = true} : vector<4x16xf32> -> vector<4x16xf32>
    %83 = arith.mulf %81, %82 : vector<4x16xf32>
    %cst_29 = arith.constant 2.000000e+00 : f32
    %84 = vector.broadcast %cst_29 : f32 to vector<4x16xf32>
    %85 = arith.subf %84, %83 : vector<4x16xf32>
    %86 = arith.mulf %82, %85 : vector<4x16xf32>
    %87 = arith.mulf %73, %86 : vector<4x16xf32>
    %88 = vector.extract_strided_slice %72 {offsets = [8, 0], sizes = [4, 16], strides = [1, 1]} : vector<24x16xf32> to vector<4x16xf32>
    %89 = arith.addf %87, %88 : vector<4x16xf32>
    %cst_30 = arith.constant 0.000000e+00 : f32
    %90 = vector.broadcast %cst_30 : f32 to vector<4x16xf32>
    %91 = arith.maximumf %89, %90 : vector<4x16xf32>
    %92 = vector.extract_strided_slice %72 {offsets = [12, 0], sizes = [4, 16], strides = [1, 1]} : vector<24x16xf32> to vector<4x16xf32>
    %93 = vector.extract_strided_slice %72 {offsets = [16, 0], sizes = [4, 16], strides = [1, 1]} : vector<24x16xf32> to vector<4x16xf32>
    %cst_31 = arith.constant -3.000000e+01 : f32
    %94 = vector.broadcast %cst_31 : f32 to vector<4x16xf32>
    %95 = arith.maximumf %93, %94 : vector<4x16xf32>
    %cst_32 = arith.constant 0.000000e+00 : f32
    %96 = vector.broadcast %cst_32 : f32 to vector<4x16xf32>
    %97 = arith.subf %96, %95 : vector<4x16xf32>
    %98 = math.exp %97 : vector<4x16xf32>
    %cst_33 = arith.constant 1.000000e+00 : f32
    %99 = vector.broadcast %cst_33 : f32 to vector<4x16xf32>
    %100 = arith.addf %99, %98 : vector<4x16xf32>
    %101 = tpu.reciprocal %100 {approx = true} : vector<4x16xf32> -> vector<4x16xf32>
    %102 = arith.mulf %100, %101 : vector<4x16xf32>
    %cst_34 = arith.constant 2.000000e+00 : f32
    %103 = vector.broadcast %cst_34 : f32 to vector<4x16xf32>
    %104 = arith.subf %103, %102 : vector<4x16xf32>
    %105 = arith.mulf %101, %104 : vector<4x16xf32>
    %106 = arith.mulf %92, %105 : vector<4x16xf32>
    %107 = vector.extract_strided_slice %72 {offsets = [20, 0], sizes = [4, 16], strides = [1, 1]} : vector<24x16xf32> to vector<4x16xf32>
    %108 = arith.addf %106, %107 : vector<4x16xf32>
    %cst_35 = arith.constant 0.000000e+00 : f32
    %109 = vector.broadcast %cst_35 : f32 to vector<4x16xf32>
    %110 = arith.maximumf %108, %109 : vector<4x16xf32>
    %111 = vector.broadcast %4 : vector<1x16xf32> to vector<4x16xf32>
    %112 = arith.mulf %91, %111 : vector<4x16xf32>
    %113 = vector.broadcast %4 : vector<1x16xf32> to vector<4x16xf32>
    %114 = arith.mulf %110, %113 : vector<4x16xf32>
    %cst_36 = arith.constant dense<0.000000e+00> : vector<4x16xf32>
    %115 = tpu.matmul %114, %3, %cst_36 {dimension_numbers = #tpu.dot_dimension_numbers<[1], [0], [0], [1], [0, 0, 1, 1], [], []>} : vector<4x16xf32>, vector<16x16xf32>, vector<4x16xf32> -> vector<4x16xf32>
    %116 = arith.addf %112, %115 : vector<4x16xf32>
    %c480 = arith.constant 480 : index
    %c0_37 = arith.constant 0 : index
    %117 = vector.load %arg1[%c480, %c0_37] : memref<1568x32xf32, #tpu.memory_space<vmem>>, vector<288x4xf32>
    %c768 = arith.constant 768 : index
    %c0_38 = arith.constant 0 : index
    %118 = vector.load %arg1[%c768, %c0_38] : memref<1568x32xf32, #tpu.memory_space<vmem>>, vector<96x1xf32>
    %cst_39 = arith.constant dense<0.000000e+00> : vector<288x16xf32>
    %119 = tpu.matmul %117, %116, %cst_39 {dimension_numbers = #tpu.dot_dimension_numbers<[1], [0], [0], [1], [0, 0, 1, 1], [], []>} : vector<288x4xf32>, vector<4x16xf32>, vector<288x16xf32> -> vector<288x16xf32>
    %120 = vector.extract_strided_slice %119 {offsets = [0, 0], sizes = [96, 16], strides = [1, 1]} : vector<288x16xf32> to vector<96x16xf32>
    %121 = vector.extract_strided_slice %119 {offsets = [96, 0], sizes = [96, 16], strides = [1, 1]} : vector<288x16xf32> to vector<96x16xf32>
    %cst_40 = arith.constant dense<0.000000e+00> : vector<96x16xf32>
    %122 = tpu.matmul %121, %1, %cst_40 {dimension_numbers = #tpu.dot_dimension_numbers<[1], [0], [0], [1], [0, 0, 1, 1], [], []>} : vector<96x16xf32>, vector<16x16xf32>, vector<96x16xf32> -> vector<96x16xf32>
    %123 = arith.addf %120, %122 : vector<96x16xf32>
    %124 = vector.extract_strided_slice %119 {offsets = [192, 0], sizes = [96, 16], strides = [1, 1]} : vector<288x16xf32> to vector<96x16xf32>
    %cst_41 = arith.constant dense<0.000000e+00> : vector<96x16xf32>
    %125 = tpu.matmul %124, %2, %cst_41 {dimension_numbers = #tpu.dot_dimension_numbers<[1], [0], [0], [1], [0, 0, 1, 1], [], []>} : vector<96x16xf32>, vector<16x16xf32>, vector<96x16xf32> -> vector<96x16xf32>
    %126 = arith.addf %123, %125 : vector<96x16xf32>
    %127 = vector.broadcast %118 : vector<96x1xf32> to vector<96x16xf32>
    %128 = arith.addf %126, %127 : vector<96x16xf32>
    %129 = vector.extract_strided_slice %128 {offsets = [0, 0], sizes = [16, 16], strides = [1, 1]} : vector<96x16xf32> to vector<16x16xf32>
    %130 = vector.extract_strided_slice %128 {offsets = [16, 0], sizes = [16, 16], strides = [1, 1]} : vector<96x16xf32> to vector<16x16xf32>
    %cst_42 = arith.constant -3.000000e+01 : f32
    %131 = vector.broadcast %cst_42 : f32 to vector<16x16xf32>
    %132 = arith.maximumf %130, %131 : vector<16x16xf32>
    %cst_43 = arith.constant 0.000000e+00 : f32
    %133 = vector.broadcast %cst_43 : f32 to vector<16x16xf32>
    %134 = arith.subf %133, %132 : vector<16x16xf32>
    %135 = math.exp %134 : vector<16x16xf32>
    %cst_44 = arith.constant 1.000000e+00 : f32
    %136 = vector.broadcast %cst_44 : f32 to vector<16x16xf32>
    %137 = arith.addf %136, %135 : vector<16x16xf32>
    %138 = tpu.reciprocal %137 {approx = true} : vector<16x16xf32> -> vector<16x16xf32>
    %139 = arith.mulf %137, %138 : vector<16x16xf32>
    %cst_45 = arith.constant 2.000000e+00 : f32
    %140 = vector.broadcast %cst_45 : f32 to vector<16x16xf32>
    %141 = arith.subf %140, %139 : vector<16x16xf32>
    %142 = arith.mulf %138, %141 : vector<16x16xf32>
    %143 = arith.mulf %129, %142 : vector<16x16xf32>
    %144 = vector.extract_strided_slice %128 {offsets = [32, 0], sizes = [16, 16], strides = [1, 1]} : vector<96x16xf32> to vector<16x16xf32>
    %145 = arith.addf %143, %144 : vector<16x16xf32>
    %cst_46 = arith.constant 0.000000e+00 : f32
    %146 = vector.broadcast %cst_46 : f32 to vector<16x16xf32>
    %147 = arith.maximumf %145, %146 : vector<16x16xf32>
    %148 = vector.extract_strided_slice %128 {offsets = [48, 0], sizes = [16, 16], strides = [1, 1]} : vector<96x16xf32> to vector<16x16xf32>
    %149 = vector.extract_strided_slice %128 {offsets = [64, 0], sizes = [16, 16], strides = [1, 1]} : vector<96x16xf32> to vector<16x16xf32>
    %cst_47 = arith.constant -3.000000e+01 : f32
    %150 = vector.broadcast %cst_47 : f32 to vector<16x16xf32>
    %151 = arith.maximumf %149, %150 : vector<16x16xf32>
    %cst_48 = arith.constant 0.000000e+00 : f32
    %152 = vector.broadcast %cst_48 : f32 to vector<16x16xf32>
    %153 = arith.subf %152, %151 : vector<16x16xf32>
    %154 = math.exp %153 : vector<16x16xf32>
    %cst_49 = arith.constant 1.000000e+00 : f32
    %155 = vector.broadcast %cst_49 : f32 to vector<16x16xf32>
    %156 = arith.addf %155, %154 : vector<16x16xf32>
    %157 = tpu.reciprocal %156 {approx = true} : vector<16x16xf32> -> vector<16x16xf32>
    %158 = arith.mulf %156, %157 : vector<16x16xf32>
    %cst_50 = arith.constant 2.000000e+00 : f32
    %159 = vector.broadcast %cst_50 : f32 to vector<16x16xf32>
    %160 = arith.subf %159, %158 : vector<16x16xf32>
    %161 = arith.mulf %157, %160 : vector<16x16xf32>
    %162 = arith.mulf %148, %161 : vector<16x16xf32>
    %163 = vector.extract_strided_slice %128 {offsets = [80, 0], sizes = [16, 16], strides = [1, 1]} : vector<96x16xf32> to vector<16x16xf32>
    %164 = arith.addf %162, %163 : vector<16x16xf32>
    %cst_51 = arith.constant 0.000000e+00 : f32
    %165 = vector.broadcast %cst_51 : f32 to vector<16x16xf32>
    %166 = arith.maximumf %164, %165 : vector<16x16xf32>
    %167 = vector.broadcast %4 : vector<1x16xf32> to vector<16x16xf32>
    %168 = arith.mulf %147, %167 : vector<16x16xf32>
    %169 = vector.broadcast %4 : vector<1x16xf32> to vector<16x16xf32>
    %170 = arith.mulf %166, %169 : vector<16x16xf32>
    %cst_52 = arith.constant dense<0.000000e+00> : vector<16x16xf32>
    %171 = tpu.matmul %170, %3, %cst_52 {dimension_numbers = #tpu.dot_dimension_numbers<[1], [0], [0], [1], [0, 0, 1, 1], [], []>} : vector<16x16xf32>, vector<16x16xf32>, vector<16x16xf32> -> vector<16x16xf32>
    %172 = arith.addf %168, %171 : vector<16x16xf32>
    %c864 = arith.constant 864 : index
    %c0_53 = arith.constant 0 : index
    %173 = vector.load %arg1[%c864, %c0_53] : memref<1568x32xf32, #tpu.memory_space<vmem>>, vector<24x16xf32>
    %cst_54 = arith.constant dense<0.000000e+00> : vector<24x16xf32>
    %174 = tpu.matmul %173, %172, %cst_54 {dimension_numbers = #tpu.dot_dimension_numbers<[1], [0], [0], [1], [0, 0, 1, 1], [], []>} : vector<24x16xf32>, vector<16x16xf32>, vector<24x16xf32> -> vector<24x16xf32>
    %c888 = arith.constant 888 : index
    %c0_55 = arith.constant 0 : index
    %175 = vector.load %arg1[%c888, %c0_55] : memref<1568x32xf32, #tpu.memory_space<vmem>>, vector<24x1xf32>
    %176 = vector.broadcast %175 : vector<24x1xf32> to vector<24x16xf32>
    %177 = arith.addf %174, %176 : vector<24x16xf32>
    %c1064 = arith.constant 1064 : index
    %c0_56 = arith.constant 0 : index
    %178 = vector.load %arg1[%c1064, %c0_56] : memref<1568x32xf32, #tpu.memory_space<vmem>>, vector<16x32xf32>
    %cst_57 = arith.constant dense<0.000000e+00> : vector<12x32xf32>
    %179 = tpu.matmul %0, %178, %cst_57 {dimension_numbers = #tpu.dot_dimension_numbers<[1], [0], [0], [1], [0, 0, 1, 1], [], []>} : vector<12x16xf32>, vector<16x32xf32>, vector<12x32xf32> -> vector<12x32xf32>
    %c968 = arith.constant 968 : index
    %c0_58 = arith.constant 0 : index
    %180 = vector.load %arg1[%c968, %c0_58] : memref<1568x32xf32, #tpu.memory_space<vmem>>, vector<12x12xf32>
    %cst_59 = arith.constant dense<0.000000e+00> : vector<12x16xf32>
    %181 = tpu.matmul %180, %0, %cst_59 {dimension_numbers = #tpu.dot_dimension_numbers<[1], [0], [0], [1], [0, 0, 1, 1], [], []>} : vector<12x12xf32>, vector<12x16xf32>, vector<12x16xf32> -> vector<12x16xf32>
    %c1080 = arith.constant 1080 : index
    %c0_60 = arith.constant 0 : index
    %182 = vector.load %arg1[%c1080, %c0_60] : memref<1568x32xf32, #tpu.memory_space<vmem>>, vector<16x32xf32>
    %cst_61 = arith.constant dense<0.000000e+00> : vector<12x32xf32>
    %183 = tpu.matmul %181, %182, %cst_61 {dimension_numbers = #tpu.dot_dimension_numbers<[1], [0], [0], [1], [0, 0, 1, 1], [], []>} : vector<12x16xf32>, vector<16x32xf32>, vector<12x32xf32> -> vector<12x32xf32>
    %184 = arith.addf %179, %183 : vector<12x32xf32>
    %c984 = arith.constant 984 : index
    %c0_62 = arith.constant 0 : index
    %185 = vector.load %arg1[%c984, %c0_62] : memref<1568x32xf32, #tpu.memory_space<vmem>>, vector<12x12xf32>
    %cst_63 = arith.constant dense<0.000000e+00> : vector<12x16xf32>
    %186 = tpu.matmul %185, %0, %cst_63 {dimension_numbers = #tpu.dot_dimension_numbers<[1], [0], [0], [1], [0, 0, 1, 1], [], []>} : vector<12x12xf32>, vector<12x16xf32>, vector<12x16xf32> -> vector<12x16xf32>
    %c1096 = arith.constant 1096 : index
    %c0_64 = arith.constant 0 : index
    %187 = vector.load %arg1[%c1096, %c0_64] : memref<1568x32xf32, #tpu.memory_space<vmem>>, vector<16x32xf32>
    %cst_65 = arith.constant dense<0.000000e+00> : vector<12x32xf32>
    %188 = tpu.matmul %186, %187, %cst_65 {dimension_numbers = #tpu.dot_dimension_numbers<[1], [0], [0], [1], [0, 0, 1, 1], [], []>} : vector<12x16xf32>, vector<16x32xf32>, vector<12x32xf32> -> vector<12x32xf32>
    %189 = arith.addf %184, %188 : vector<12x32xf32>
    %c1000 = arith.constant 1000 : index
    %c0_66 = arith.constant 0 : index
    %190 = vector.load %arg1[%c1000, %c0_66] : memref<1568x32xf32, #tpu.memory_space<vmem>>, vector<12x12xf32>
    %cst_67 = arith.constant dense<0.000000e+00> : vector<12x16xf32>
    %191 = tpu.matmul %190, %0, %cst_67 {dimension_numbers = #tpu.dot_dimension_numbers<[1], [0], [0], [1], [0, 0, 1, 1], [], []>} : vector<12x12xf32>, vector<12x16xf32>, vector<12x16xf32> -> vector<12x16xf32>
    %c1112 = arith.constant 1112 : index
    %c0_68 = arith.constant 0 : index
    %192 = vector.load %arg1[%c1112, %c0_68] : memref<1568x32xf32, #tpu.memory_space<vmem>>, vector<16x32xf32>
    %cst_69 = arith.constant dense<0.000000e+00> : vector<12x32xf32>
    %193 = tpu.matmul %191, %192, %cst_69 {dimension_numbers = #tpu.dot_dimension_numbers<[1], [0], [0], [1], [0, 0, 1, 1], [], []>} : vector<12x16xf32>, vector<16x32xf32>, vector<12x32xf32> -> vector<12x32xf32>
    %194 = arith.addf %189, %193 : vector<12x32xf32>
    %c1016 = arith.constant 1016 : index
    %c0_70 = arith.constant 0 : index
    %195 = vector.load %arg1[%c1016, %c0_70] : memref<1568x32xf32, #tpu.memory_space<vmem>>, vector<12x12xf32>
    %cst_71 = arith.constant dense<0.000000e+00> : vector<12x16xf32>
    %196 = tpu.matmul %195, %0, %cst_71 {dimension_numbers = #tpu.dot_dimension_numbers<[1], [0], [0], [1], [0, 0, 1, 1], [], []>} : vector<12x12xf32>, vector<12x16xf32>, vector<12x16xf32> -> vector<12x16xf32>
    %c1128 = arith.constant 1128 : index
    %c0_72 = arith.constant 0 : index
    %197 = vector.load %arg1[%c1128, %c0_72] : memref<1568x32xf32, #tpu.memory_space<vmem>>, vector<16x32xf32>
    %cst_73 = arith.constant dense<0.000000e+00> : vector<12x32xf32>
    %198 = tpu.matmul %196, %197, %cst_73 {dimension_numbers = #tpu.dot_dimension_numbers<[1], [0], [0], [1], [0, 0, 1, 1], [], []>} : vector<12x16xf32>, vector<16x32xf32>, vector<12x32xf32> -> vector<12x32xf32>
    %199 = arith.addf %194, %198 : vector<12x32xf32>
    %c1032 = arith.constant 1032 : index
    %c0_74 = arith.constant 0 : index
    %200 = vector.load %arg1[%c1032, %c0_74] : memref<1568x32xf32, #tpu.memory_space<vmem>>, vector<12x12xf32>
    %cst_75 = arith.constant dense<0.000000e+00> : vector<12x16xf32>
    %201 = tpu.matmul %200, %0, %cst_75 {dimension_numbers = #tpu.dot_dimension_numbers<[1], [0], [0], [1], [0, 0, 1, 1], [], []>} : vector<12x12xf32>, vector<12x16xf32>, vector<12x16xf32> -> vector<12x16xf32>
    %c1144 = arith.constant 1144 : index
    %c0_76 = arith.constant 0 : index
    %202 = vector.load %arg1[%c1144, %c0_76] : memref<1568x32xf32, #tpu.memory_space<vmem>>, vector<16x32xf32>
    %cst_77 = arith.constant dense<0.000000e+00> : vector<12x32xf32>
    %203 = tpu.matmul %201, %202, %cst_77 {dimension_numbers = #tpu.dot_dimension_numbers<[1], [0], [0], [1], [0, 0, 1, 1], [], []>} : vector<12x16xf32>, vector<16x32xf32>, vector<12x32xf32> -> vector<12x32xf32>
    %204 = arith.addf %199, %203 : vector<12x32xf32>
    %c1048 = arith.constant 1048 : index
    %c0_78 = arith.constant 0 : index
    %205 = vector.load %arg1[%c1048, %c0_78] : memref<1568x32xf32, #tpu.memory_space<vmem>>, vector<12x12xf32>
    %cst_79 = arith.constant dense<0.000000e+00> : vector<12x16xf32>
    %206 = tpu.matmul %205, %0, %cst_79 {dimension_numbers = #tpu.dot_dimension_numbers<[1], [0], [0], [1], [0, 0, 1, 1], [], []>} : vector<12x12xf32>, vector<12x16xf32>, vector<12x16xf32> -> vector<12x16xf32>
    %c1160 = arith.constant 1160 : index
    %c0_80 = arith.constant 0 : index
    %207 = vector.load %arg1[%c1160, %c0_80] : memref<1568x32xf32, #tpu.memory_space<vmem>>, vector<16x32xf32>
    %cst_81 = arith.constant dense<0.000000e+00> : vector<12x32xf32>
    %208 = tpu.matmul %206, %207, %cst_81 {dimension_numbers = #tpu.dot_dimension_numbers<[1], [0], [0], [1], [0, 0, 1, 1], [], []>} : vector<12x16xf32>, vector<16x32xf32>, vector<12x32xf32> -> vector<12x32xf32>
    %209 = arith.addf %204, %208 : vector<12x32xf32>
    %c1176 = arith.constant 1176 : index
    %c0_82 = arith.constant 0 : index
    %210 = vector.load %arg1[%c1176, %c0_82] : memref<1568x32xf32, #tpu.memory_space<vmem>>, vector<1x32xf32>
    %211 = vector.broadcast %210 : vector<1x32xf32> to vector<12x32xf32>
    %212 = arith.addf %209, %211 : vector<12x32xf32>
    %cst_83 = arith.constant 0.000000e+00 : f32
    %213 = vector.broadcast %cst_83 : f32 to vector<12x32xf32>
    %214 = arith.maximumf %212, %213 : vector<12x32xf32>
    %c1248 = arith.constant 1248 : index
    %c0_84 = arith.constant 0 : index
    %215 = vector.load %arg1[%c1248, %c0_84] : memref<1568x32xf32, #tpu.memory_space<vmem>>, vector<32x8xf32>
    %cst_85 = arith.constant dense<0.000000e+00> : vector<12x8xf32>
    %216 = tpu.matmul %214, %215, %cst_85 {dimension_numbers = #tpu.dot_dimension_numbers<[1], [0], [0], [1], [0, 0, 1, 1], [], []>} : vector<12x32xf32>, vector<32x8xf32>, vector<12x8xf32> -> vector<12x8xf32>
    %c1184 = arith.constant 1184 : index
    %c0_86 = arith.constant 0 : index
    %217 = vector.load %arg1[%c1184, %c0_86] : memref<1568x32xf32, #tpu.memory_space<vmem>>, vector<12x12xf32>
    %cst_87 = arith.constant dense<0.000000e+00> : vector<12x32xf32>
    %218 = tpu.matmul %217, %214, %cst_87 {dimension_numbers = #tpu.dot_dimension_numbers<[1], [0], [0], [1], [0, 0, 1, 1], [], []>} : vector<12x12xf32>, vector<12x32xf32>, vector<12x32xf32> -> vector<12x32xf32>
    %c1280 = arith.constant 1280 : index
    %c0_88 = arith.constant 0 : index
    %219 = vector.load %arg1[%c1280, %c0_88] : memref<1568x32xf32, #tpu.memory_space<vmem>>, vector<32x8xf32>
    %cst_89 = arith.constant dense<0.000000e+00> : vector<12x8xf32>
    %220 = tpu.matmul %218, %219, %cst_89 {dimension_numbers = #tpu.dot_dimension_numbers<[1], [0], [0], [1], [0, 0, 1, 1], [], []>} : vector<12x32xf32>, vector<32x8xf32>, vector<12x8xf32> -> vector<12x8xf32>
    %221 = arith.addf %216, %220 : vector<12x8xf32>
    %c1200 = arith.constant 1200 : index
    %c0_90 = arith.constant 0 : index
    %222 = vector.load %arg1[%c1200, %c0_90] : memref<1568x32xf32, #tpu.memory_space<vmem>>, vector<12x12xf32>
    %cst_91 = arith.constant dense<0.000000e+00> : vector<12x32xf32>
    %223 = tpu.matmul %222, %214, %cst_91 {dimension_numbers = #tpu.dot_dimension_numbers<[1], [0], [0], [1], [0, 0, 1, 1], [], []>} : vector<12x12xf32>, vector<12x32xf32>, vector<12x32xf32> -> vector<12x32xf32>
    %c1312 = arith.constant 1312 : index
    %c0_92 = arith.constant 0 : index
    %224 = vector.load %arg1[%c1312, %c0_92] : memref<1568x32xf32, #tpu.memory_space<vmem>>, vector<32x8xf32>
    %cst_93 = arith.constant dense<0.000000e+00> : vector<12x8xf32>
    %225 = tpu.matmul %223, %224, %cst_93 {dimension_numbers = #tpu.dot_dimension_numbers<[1], [0], [0], [1], [0, 0, 1, 1], [], []>} : vector<12x32xf32>, vector<32x8xf32>, vector<12x8xf32> -> vector<12x8xf32>
    %226 = arith.addf %221, %225 : vector<12x8xf32>
    %c1216 = arith.constant 1216 : index
    %c0_94 = arith.constant 0 : index
    %227 = vector.load %arg1[%c1216, %c0_94] : memref<1568x32xf32, #tpu.memory_space<vmem>>, vector<12x12xf32>
    %cst_95 = arith.constant dense<0.000000e+00> : vector<12x32xf32>
    %228 = tpu.matmul %227, %214, %cst_95 {dimension_numbers = #tpu.dot_dimension_numbers<[1], [0], [0], [1], [0, 0, 1, 1], [], []>} : vector<12x12xf32>, vector<12x32xf32>, vector<12x32xf32> -> vector<12x32xf32>
    %c1344 = arith.constant 1344 : index
    %c0_96 = arith.constant 0 : index
    %229 = vector.load %arg1[%c1344, %c0_96] : memref<1568x32xf32, #tpu.memory_space<vmem>>, vector<32x8xf32>
    %cst_97 = arith.constant dense<0.000000e+00> : vector<12x8xf32>
    %230 = tpu.matmul %228, %229, %cst_97 {dimension_numbers = #tpu.dot_dimension_numbers<[1], [0], [0], [1], [0, 0, 1, 1], [], []>} : vector<12x32xf32>, vector<32x8xf32>, vector<12x8xf32> -> vector<12x8xf32>
    %231 = arith.addf %226, %230 : vector<12x8xf32>
    %c1232 = arith.constant 1232 : index
    %c0_98 = arith.constant 0 : index
    %232 = vector.load %arg1[%c1232, %c0_98] : memref<1568x32xf32, #tpu.memory_space<vmem>>, vector<12x12xf32>
    %cst_99 = arith.constant dense<0.000000e+00> : vector<12x32xf32>
    %233 = tpu.matmul %232, %214, %cst_99 {dimension_numbers = #tpu.dot_dimension_numbers<[1], [0], [0], [1], [0, 0, 1, 1], [], []>} : vector<12x12xf32>, vector<12x32xf32>, vector<12x32xf32> -> vector<12x32xf32>
    %c1376 = arith.constant 1376 : index
    %c0_100 = arith.constant 0 : index
    %234 = vector.load %arg1[%c1376, %c0_100] : memref<1568x32xf32, #tpu.memory_space<vmem>>, vector<32x8xf32>
    %cst_101 = arith.constant dense<0.000000e+00> : vector<12x8xf32>
    %235 = tpu.matmul %233, %234, %cst_101 {dimension_numbers = #tpu.dot_dimension_numbers<[1], [0], [0], [1], [0, 0, 1, 1], [], []>} : vector<12x32xf32>, vector<32x8xf32>, vector<12x8xf32> -> vector<12x8xf32>
    %236 = arith.addf %231, %235 : vector<12x8xf32>
    %c1408 = arith.constant 1408 : index
    %c0_102 = arith.constant 0 : index
    %237 = vector.load %arg1[%c1408, %c0_102] : memref<1568x32xf32, #tpu.memory_space<vmem>>, vector<1x8xf32>
    %238 = vector.broadcast %237 : vector<1x8xf32> to vector<12x8xf32>
    %239 = arith.addf %236, %238 : vector<12x8xf32>
    %cst_103 = arith.constant 0.000000e+00 : f32
    %240 = vector.broadcast %cst_103 : f32 to vector<12x8xf32>
    %241 = arith.maximumf %239, %240 : vector<12x8xf32>
    %c1480 = arith.constant 1480 : index
    %c0_104 = arith.constant 0 : index
    %242 = vector.load %arg1[%c1480, %c0_104] : memref<1568x32xf32, #tpu.memory_space<vmem>>, vector<8x32xf32>
    %cst_105 = arith.constant dense<0.000000e+00> : vector<12x32xf32>
    %243 = tpu.matmul %241, %242, %cst_105 {dimension_numbers = #tpu.dot_dimension_numbers<[1], [0], [0], [1], [0, 0, 1, 1], [], []>} : vector<12x8xf32>, vector<8x32xf32>, vector<12x32xf32> -> vector<12x32xf32>
    %c1416 = arith.constant 1416 : index
    %c0_106 = arith.constant 0 : index
    %244 = vector.load %arg1[%c1416, %c0_106] : memref<1568x32xf32, #tpu.memory_space<vmem>>, vector<12x12xf32>
    %cst_107 = arith.constant dense<0.000000e+00> : vector<12x8xf32>
    %245 = tpu.matmul %244, %241, %cst_107 {dimension_numbers = #tpu.dot_dimension_numbers<[1], [0], [0], [1], [0, 0, 1, 1], [], []>} : vector<12x12xf32>, vector<12x8xf32>, vector<12x8xf32> -> vector<12x8xf32>
    %c1488 = arith.constant 1488 : index
    %c0_108 = arith.constant 0 : index
    %246 = vector.load %arg1[%c1488, %c0_108] : memref<1568x32xf32, #tpu.memory_space<vmem>>, vector<8x32xf32>
    %cst_109 = arith.constant dense<0.000000e+00> : vector<12x32xf32>
    %247 = tpu.matmul %245, %246, %cst_109 {dimension_numbers = #tpu.dot_dimension_numbers<[1], [0], [0], [1], [0, 0, 1, 1], [], []>} : vector<12x8xf32>, vector<8x32xf32>, vector<12x32xf32> -> vector<12x32xf32>
    %248 = arith.addf %243, %247 : vector<12x32xf32>
    %c1432 = arith.constant 1432 : index
    %c0_110 = arith.constant 0 : index
    %249 = vector.load %arg1[%c1432, %c0_110] : memref<1568x32xf32, #tpu.memory_space<vmem>>, vector<12x12xf32>
    %cst_111 = arith.constant dense<0.000000e+00> : vector<12x8xf32>
    %250 = tpu.matmul %249, %241, %cst_111 {dimension_numbers = #tpu.dot_dimension_numbers<[1], [0], [0], [1], [0, 0, 1, 1], [], []>} : vector<12x12xf32>, vector<12x8xf32>, vector<12x8xf32> -> vector<12x8xf32>
    %c1496 = arith.constant 1496 : index
    %c0_112 = arith.constant 0 : index
    %251 = vector.load %arg1[%c1496, %c0_112] : memref<1568x32xf32, #tpu.memory_space<vmem>>, vector<8x32xf32>
    %cst_113 = arith.constant dense<0.000000e+00> : vector<12x32xf32>
    %252 = tpu.matmul %250, %251, %cst_113 {dimension_numbers = #tpu.dot_dimension_numbers<[1], [0], [0], [1], [0, 0, 1, 1], [], []>} : vector<12x8xf32>, vector<8x32xf32>, vector<12x32xf32> -> vector<12x32xf32>
    %253 = arith.addf %248, %252 : vector<12x32xf32>
    %c1448 = arith.constant 1448 : index
    %c0_114 = arith.constant 0 : index
    %254 = vector.load %arg1[%c1448, %c0_114] : memref<1568x32xf32, #tpu.memory_space<vmem>>, vector<12x12xf32>
    %cst_115 = arith.constant dense<0.000000e+00> : vector<12x8xf32>
    %255 = tpu.matmul %254, %241, %cst_115 {dimension_numbers = #tpu.dot_dimension_numbers<[1], [0], [0], [1], [0, 0, 1, 1], [], []>} : vector<12x12xf32>, vector<12x8xf32>, vector<12x8xf32> -> vector<12x8xf32>
    %c1504 = arith.constant 1504 : index
    %c0_116 = arith.constant 0 : index
    %256 = vector.load %arg1[%c1504, %c0_116] : memref<1568x32xf32, #tpu.memory_space<vmem>>, vector<8x32xf32>
    %cst_117 = arith.constant dense<0.000000e+00> : vector<12x32xf32>
    %257 = tpu.matmul %255, %256, %cst_117 {dimension_numbers = #tpu.dot_dimension_numbers<[1], [0], [0], [1], [0, 0, 1, 1], [], []>} : vector<12x8xf32>, vector<8x32xf32>, vector<12x32xf32> -> vector<12x32xf32>
    %258 = arith.addf %253, %257 : vector<12x32xf32>
    %c1464 = arith.constant 1464 : index
    %c0_118 = arith.constant 0 : index
    %259 = vector.load %arg1[%c1464, %c0_118] : memref<1568x32xf32, #tpu.memory_space<vmem>>, vector<12x12xf32>
    %cst_119 = arith.constant dense<0.000000e+00> : vector<12x8xf32>
    %260 = tpu.matmul %259, %241, %cst_119 {dimension_numbers = #tpu.dot_dimension_numbers<[1], [0], [0], [1], [0, 0, 1, 1], [], []>} : vector<12x12xf32>, vector<12x8xf32>, vector<12x8xf32> -> vector<12x8xf32>
    %c1512 = arith.constant 1512 : index
    %c0_120 = arith.constant 0 : index
    %261 = vector.load %arg1[%c1512, %c0_120] : memref<1568x32xf32, #tpu.memory_space<vmem>>, vector<8x32xf32>
    %cst_121 = arith.constant dense<0.000000e+00> : vector<12x32xf32>
    %262 = tpu.matmul %260, %261, %cst_121 {dimension_numbers = #tpu.dot_dimension_numbers<[1], [0], [0], [1], [0, 0, 1, 1], [], []>} : vector<12x8xf32>, vector<8x32xf32>, vector<12x32xf32> -> vector<12x32xf32>
    %263 = arith.addf %258, %262 : vector<12x32xf32>
    %c1520 = arith.constant 1520 : index
    %c0_122 = arith.constant 0 : index
    %264 = vector.load %arg1[%c1520, %c0_122] : memref<1568x32xf32, #tpu.memory_space<vmem>>, vector<1x32xf32>
    %265 = vector.broadcast %264 : vector<1x32xf32> to vector<12x32xf32>
    %266 = arith.addf %263, %265 : vector<12x32xf32>
    %cst_123 = arith.constant 0.000000e+00 : f32
    %267 = vector.broadcast %cst_123 : f32 to vector<12x32xf32>
    %268 = arith.maximumf %266, %267 : vector<12x32xf32>
    %c1528 = arith.constant 1528 : index
    %c0_124 = arith.constant 0 : index
    %269 = vector.load %arg1[%c1528, %c0_124] : memref<1568x32xf32, #tpu.memory_space<vmem>>, vector<32x32xf32>
    %cst_125 = arith.constant dense<0.000000e+00> : vector<12x32xf32>
    %270 = tpu.matmul %268, %269, %cst_125 {dimension_numbers = #tpu.dot_dimension_numbers<[1], [0], [0], [1], [0, 0, 1, 1], [], []>} : vector<12x32xf32>, vector<32x32xf32>, vector<12x32xf32> -> vector<12x32xf32>
    %c1560 = arith.constant 1560 : index
    %c0_126 = arith.constant 0 : index
    %271 = vector.load %arg1[%c1560, %c0_126] : memref<1568x32xf32, #tpu.memory_space<vmem>>, vector<1x32xf32>
    %272 = vector.broadcast %271 : vector<1x32xf32> to vector<12x32xf32>
    %273 = arith.addf %270, %272 : vector<12x32xf32>
    %274 = vector.extract_strided_slice %177 {offsets = [0, 0], sizes = [12, 16], strides = [1, 1]} : vector<24x16xf32> to vector<12x16xf32>
    %cst_127 = arith.constant 0.000000e+00 : f32
    %275 = vector.broadcast %cst_127 : f32 to vector<12x16xf32>
    %276 = arith.maximumf %274, %275 : vector<12x16xf32>
    %277 = math.absf %274 : vector<12x16xf32>
    %cst_128 = arith.constant 0.000000e+00 : f32
    %278 = vector.broadcast %cst_128 : f32 to vector<12x16xf32>
    %279 = arith.subf %278, %277 : vector<12x16xf32>
    %280 = math.exp %279 : vector<12x16xf32>
    %cst_129 = arith.constant 1.000000e+00 : f32
    %281 = vector.broadcast %cst_129 : f32 to vector<12x16xf32>
    %282 = arith.addf %281, %280 : vector<12x16xf32>
    %283 = math.log %282 : vector<12x16xf32>
    %284 = arith.addf %276, %283 : vector<12x16xf32>
    %285 = vector.extract_strided_slice %273 {offsets = [0, 0], sizes = [12, 16], strides = [1, 1]} : vector<12x32xf32> to vector<12x16xf32>
    %cst_130 = arith.constant 0.000000e+00 : f32
    %286 = vector.broadcast %cst_130 : f32 to vector<12x16xf32>
    %287 = arith.maximumf %285, %286 : vector<12x16xf32>
    %288 = math.absf %285 : vector<12x16xf32>
    %cst_131 = arith.constant 0.000000e+00 : f32
    %289 = vector.broadcast %cst_131 : f32 to vector<12x16xf32>
    %290 = arith.subf %289, %288 : vector<12x16xf32>
    %291 = math.exp %290 : vector<12x16xf32>
    %cst_132 = arith.constant 1.000000e+00 : f32
    %292 = vector.broadcast %cst_132 : f32 to vector<12x16xf32>
    %293 = arith.addf %292, %291 : vector<12x16xf32>
    %294 = math.log %293 : vector<12x16xf32>
    %295 = arith.addf %287, %294 : vector<12x16xf32>
    %296 = arith.mulf %284, %295 : vector<12x16xf32>
    %297 = vector.extract_strided_slice %177 {offsets = [12, 0], sizes = [12, 16], strides = [1, 1]} : vector<24x16xf32> to vector<12x16xf32>
    %cst_133 = arith.constant -3.000000e+01 : f32
    %298 = vector.broadcast %cst_133 : f32 to vector<12x16xf32>
    %299 = arith.maximumf %297, %298 : vector<12x16xf32>
    %cst_134 = arith.constant 0.000000e+00 : f32
    %300 = vector.broadcast %cst_134 : f32 to vector<12x16xf32>
    %301 = arith.subf %300, %299 : vector<12x16xf32>
    %302 = math.exp %301 : vector<12x16xf32>
    %cst_135 = arith.constant 1.000000e+00 : f32
    %303 = vector.broadcast %cst_135 : f32 to vector<12x16xf32>
    %304 = arith.addf %303, %302 : vector<12x16xf32>
    %305 = tpu.reciprocal %304 {approx = true} : vector<12x16xf32> -> vector<12x16xf32>
    %306 = arith.mulf %304, %305 : vector<12x16xf32>
    %cst_136 = arith.constant 2.000000e+00 : f32
    %307 = vector.broadcast %cst_136 : f32 to vector<12x16xf32>
    %308 = arith.subf %307, %306 : vector<12x16xf32>
    %309 = arith.mulf %305, %308 : vector<12x16xf32>
    %310 = vector.extract_strided_slice %273 {offsets = [0, 16], sizes = [12, 16], strides = [1, 1]} : vector<12x32xf32> to vector<12x16xf32>
    %cst_137 = arith.constant -3.000000e+01 : f32
    %311 = vector.broadcast %cst_137 : f32 to vector<12x16xf32>
    %312 = arith.maximumf %310, %311 : vector<12x16xf32>
    %cst_138 = arith.constant 0.000000e+00 : f32
    %313 = vector.broadcast %cst_138 : f32 to vector<12x16xf32>
    %314 = arith.subf %313, %312 : vector<12x16xf32>
    %315 = math.exp %314 : vector<12x16xf32>
    %cst_139 = arith.constant 1.000000e+00 : f32
    %316 = vector.broadcast %cst_139 : f32 to vector<12x16xf32>
    %317 = arith.addf %316, %315 : vector<12x16xf32>
    %318 = tpu.reciprocal %317 {approx = true} : vector<12x16xf32> -> vector<12x16xf32>
    %319 = arith.mulf %317, %318 : vector<12x16xf32>
    %cst_140 = arith.constant 2.000000e+00 : f32
    %320 = vector.broadcast %cst_140 : f32 to vector<12x16xf32>
    %321 = arith.subf %320, %319 : vector<12x16xf32>
    %322 = arith.mulf %318, %321 : vector<12x16xf32>
    %323 = arith.mulf %309, %322 : vector<12x16xf32>
    %324 = tpu.concatenate %296, %323 in 0 : vector<12x16xf32>, vector<12x16xf32> -> vector<24x16xf32>
    %c0_141 = arith.constant 0 : index
    %c0_142 = arith.constant 0 : index
    %325 = vector.load %arg2[%c0_141, %c0_142] : memref<24x16xf32, #tpu.memory_space<vmem>>, vector<24x16xf32>
    tpu.vector_store %arg2[%c0_141, %c0_142], %324 {strides = array<i32>} : memref<24x16xf32, #tpu.memory_space<vmem>>, vector<24x16xf32>,
    return
  }
}

</mosaic_0001>

<bundles_post_ra>
// kernel: forward.1
= control target key start
LH: loop header
LB: loop body
LE: loop exit
PB: predicated region body
PF: predicated region fallthrough
CT: control target
= control target key end

     0   :  { %vm177_vm0 = vcmask 1043456   ;;  %vm68_vm1 = vcmask 97280   ;;  %vm6752_vm2 = vmmov 1   ;;  %v6753_v47 = vmov 0   ;;  %s6757_s13 = smov 112   ;;  %s7790_s0 = inlined_call_operand.vmem [shape: f32[12,16], index: 0, kind: input, shape index: {}]   ;;  %s7791_s1 = inlined_call_operand.vmem [shape: f32[1568,32], index: 1, kind: input, shape index: {}]   ;;  %s7792_s2 = inlined_call_operand.vmem [shape: f32[24,16], index: 2, kind: output, shape index: {}]  }
   0x1   :  { %v11_v0 = vld [vmem:[%s7790_s0] sm:$0xff]  ;;  %v12_v1 = vld [vmem:[%s7790_s0 + $0x8] sm:$0xf]  ;;  %vm6780_vm3 = vmpackc.low %vm177_vm0, %vm6752_vm2  ;;  %6676 = vset.pattern.permute.xlu0 %v6753_v47  ;;  %6677 = vset.pattern.permute.xlu1 %v6753_v47  ;;  %vm426_vm4 = vcmask 130048   ;;  %vm6755_vm5 = vmmov 0   ;;  %vm1490_vm6 = vcmask 31744  }
   0x2   :  { %v6784_v3 = vpack.c.bf16 %v12_v1, %v11_v0  ;;  %v20_v4 = vld [vmem:[%s7791_s1] sm:$0xff]  ;;  %v21_v5 = vld [vmem:[%s7791_s1 + $0x8] sm:$0xff]  ;;  %v22_v6 = vld [vmem:[%s7791_s1 + $0x10] sm:$0xff]  ;;  %vm3701_vm7 = vcmask 261120   ;;  %vm4470_vm8 = vcmask 64512  }
   0x3   :  { %5862 = vmatprep.mubr.msk.f32.mxu0 %vm68_vm1, %v20_v4  ;;  %v23_v7 = vld [vmem:[%s7791_s1 + $0x18] sm:$0xff]  ;;  %v24_v8 = vld [vmem:[%s7791_s1 + $0x20] sm:$0xff]  ;;  %v25_v9 = vld [vmem:[%s7791_s1 + $0x28] sm:$0xff] }
   0x4   :  { %6391 = vmatprep.subr.msk.bf16.mxu0 %vm6780_vm3, %v6784_v3  ;;  %v26_v10 = vld [vmem:[%s7791_s1 + $0x30] sm:$0xff]  ;;  %v14_v12 = vld [vmem:[%s7791_s1 + $0x398] sm:$0xff]  ;;  %v28_v15 = vld [vmem:[%s7791_s1 + $0x40] sm:$0xff] }
   0x5   :  { %6394 = vmatpush3.bf16.msk.msra.mxu0 %vm6780_vm3, %v6784_v3  ;;  %v13_v11 = vld [vmem:[%s7791_s1 + $0x390] sm:$0xff]  ;;  %v27_v14 = vld [vmem:[%s7791_s1 + $0x38] sm:$0xff]  ;;  %v29_v16 = vld [vmem:[%s7791_s1 + $0x48] sm:$0xff] }
   0x6   :  { %v6824_v13 = vpack.c.bf16 %v14_v12, %v13_v11  ;;  %v30_v17 = vld [vmem:[%s7791_s1 + $0x50] sm:$0xff]  ;;  %v31_v18 = vld [vmem:[%s7791_s1 + $0x58] sm:$0xff]  ;;  %v32_v19 = vld [vmem:[%s7791_s1 + $0x60] sm:$0xff] }
   0x7   :  { %v33_v20 = vld [vmem:[%s7791_s1 + $0x68] sm:$0xff]  ;;  %v34_v21 = vld [vmem:[%s7791_s1 + $0x70] sm:$0xff]  ;;  %v35_v22 = vld [vmem:[%s7791_s1 + $0x78] sm:$0xff] }
   0x8   :  { %5863 = vmatmul.mubr.msk.f32.vlgmr.msra.gmra.mrb[0].mxu0 %vm68_vm1, %v21_v5  ;;  %6396 = vmatprep.subr.bf16.mxu0 %v6824_v13  ;;  %v36_v23 = vld [vmem:[%s7791_s1 + $0x80] sm:$0xff]  ;;  %v37_v24 = vld [vmem:[%s7791_s1 + $0x88] sm:$0xff]  ;;  %v38_v25 = vld [vmem:[%s7791_s1 + $0x90] sm:$0xff] }
   0x9   :  { %5865 = vmatprep.mubr.msk.f32.mxu0 %vm68_vm1, %v22_v6  ;;  %6398 = vmatpush3.bf16.msra.mxu0 %v6824_v13  ;;  %v39_v26 = vld [vmem:[%s7791_s1 + $0x98] sm:$0xff]  ;;  %v40_v27 = vld [vmem:[%s7791_s1 + $0xa0] sm:$0xff]  ;;  %v41_v28 = vld [vmem:[%s7791_s1 + $0xa8] sm:$0xff] }
   0xa   :  { %v42_v29 = vld [vmem:[%s7791_s1 + $0xb0] sm:$0xff]  ;;  %v43_v30 = vld [vmem:[%s7791_s1 + $0xb8] sm:$0xff]  ;;  %v44_v31 = vld [vmem:[%s7791_s1 + $0xc0] sm:$0xff] }
   0xb   :  { %v45_v32 = vld [vmem:[%s7791_s1 + $0xc8] sm:$0xff]  ;;  %v46_v33 = vld [vmem:[%s7791_s1 + $0xd0] sm:$0xff]  ;;  %v47_v34 = vld [vmem:[%s7791_s1 + $0xd8] sm:$0xff] }
   0xc   :  { %5866 = vmatmul.mubr.msk.f32.gmra.mrb[2].mxu0 %vm68_vm1, %v23_v7  ;;  %v48_v35 = vld [vmem:[%s7791_s1 + $0xe0] sm:$0xff]  ;;  %v49_v36 = vld [vmem:[%s7791_s1 + $0xe8] sm:$0xff]  ;;  %v50_v37 = vld [vmem:[%s7791_s1 + $0xf0] sm:$0xff] }
   0xd   :  { %5868 = vmatprep.mubr.msk.f32.mxu0 %vm68_vm1, %v24_v8  ;;  %v51_v38 = vld [vmem:[%s7791_s1 + $0xf8] sm:$0xff]  ;;  %v52_v39 = vld [vmem:[%s7791_s1 + $0x100] sm:$0xff]  ;;  %v53_v40 = vld [vmem:[%s7791_s1 + $0x108] sm:$0xff] }
   0xe   :  { %v54_v41 = vld [vmem:[%s7791_s1 + $0x110] sm:$0xff]  ;;  %v55_v42 = vld [vmem:[%s7791_s1 + $0x118] sm:$0xff]  ;;  %v15_v43 = vld [vmem:[%s7791_s1 + $0x3a0] sm:$0xff] }
   0xf   :  { %v16_v44 = vld [vmem:[%s7791_s1 + $0x3a8] sm:$0xff]  ;;  %v64_v46 = vld [vmem:[%s7791_s1 + $0x160] sm:$0xff]  ;;  %v62_v48 = vld [vmem:[%s7791_s1 + $0x150] sm:$0xff] }
  0x10   :  { %5869 = vmatmul.mubr.msk.f32.gmra.mrb[4].mxu0 %vm68_vm1, %v25_v9  ;;  %v6952_v45 = vpack.c.bf16 %v16_v44, %v15_v43  ;;  %815 = vperm.xlu0 %6676, %v64_v46   ;;  %v65_v49 = vld [vmem:[%s7791_s1 + $0x168] sm:$0xff]  ;;  %v63_v50 = vld [vmem:[%s7791_s1 + $0x158] sm:$0xff]  ;;  %v66_v51 = vld [vmem:[%s7791_s1 + $0x170] sm:$0xff] }
  0x11   :  { %5871 = vmatprep.mubr.msk.f32.mxu0 %vm68_vm1, %v26_v10  ;;  %805 = vperm.xlu1 %6677, %v62_v48   ;;  %v67_v52 = vld [vmem:[%s7791_s1 + $0x178] sm:$0xff]  ;;  %v58_v53 = vld [vmem:[%s7791_s1 + $0x130] sm:$0xff]  ;;  %v56_v55 = vld [vmem:[%s7791_s1 + $0x120] sm:$0xff] }
  0x12   :  { %6400 = vmatprep.subr.bf16.mxu0 %v6952_v45  ;;  %v59_v54 = vld [vmem:[%s7791_s1 + $0x138] sm:$0xff]  ;;  %v57_v56 = vld [vmem:[%s7791_s1 + $0x128] sm:$0xff]  ;;  %v60_v57 = vld [vmem:[%s7791_s1 + $0x140] sm:$0xff] }
  0x13   :  { %v61_v58 = vld [vmem:[%s7791_s1 + $0x148] sm:$0xff]  ;;  %v995_v59 = vld [vmem:[%s7791_s1 + $0x1d8] sm:$0xff]  ;;  %v994_v60 = vld [vmem:[%s7791_s1 + $0x1d0] sm:$0xff] }
  0x14   :  { %5872 = vmatmul.mubr.msk.f32.gmra.mrb[6].mxu0 %vm68_vm1, %v27_v14  ;;  %820 = vperm.xlu0 %6676, %v65_v49   ;;  %v993_v61 = vld [vmem:[%s7791_s1 + $0x1c8] sm:$0xff]  ;;  %v1486_v62 = vld [vmem:[%s7791_s1 + $0x340] sm:$0xff]  ;;  %v1484_v0 = vld [vmem:[%s7791_s1 + $0x330] sm:$0xff] }
  0x15   :  { %5874 = vmatprep.mubr.msk.f32.mxu0 %vm68_vm1, %v28_v15  ;;  %810 = vperm.xlu1 %6677, %v63_v50   ;;  %v1487_v63 = vld [vmem:[%s7791_s1 + $0x348] sm:$0xff]  ;;  %v1485_v1 = vld [vmem:[%s7791_s1 + $0x338] sm:$0xff]  ;;  %v1488_v4 = vld [vmem:[%s7791_s1 + $0x350] sm:$0xff] }
  0x16   :  { %v1489_v5 = vld [vmem:[%s7791_s1 + $0x358] sm:$0xff]  ;;  %v1480_v6 = vld [vmem:[%s7791_s1 + $0x310] sm:$0xff]  ;;  %v1478_v8 = vld [vmem:[%s7791_s1 + $0x300] sm:$0xff] }
  0x17   :  { %v1481_v7 = vld [vmem:[%s7791_s1 + $0x318] sm:$0xff]  ;;  %v1479_v9 = vld [vmem:[%s7791_s1 + $0x308] sm:$0xff]  ;;  %v1482_v10 = vld [vmem:[%s7791_s1 + $0x320] sm:$0xff] }
  0x18   :  { %5875 = vmatmul.mubr.msk.f32.gmra.mrb[8].mxu0 %vm68_vm1, %v29_v16  ;;  %825 = vperm.xlu0 %6676, %v66_v51   ;;  %v1483_v11 = vld [vmem:[%s7791_s1 + $0x328] sm:$0xff]  ;;  %v2404_v12 = vld [vmem:[%s7791_s1 + $0x380] sm:$0xff]  ;;  %v2403_v15 = vld [vmem:[%s7791_s1 + $0x378] sm:$0xff] }
  0x19   :  { %5877 = vmatprep.mubr.msk.f32.mxu0 %vm68_vm1, %v30_v17  ;;  %830 = vperm.xlu1 %6677, %v67_v52   ;;  %v2405_v14 = vld [vmem:[%s7791_s1 + $0x388] sm:$0xff] }
  0x1c   :  { %5878 = vmatmul.mubr.msk.f32.gmra.mrb[10].mxu0 %vm68_vm1, %v31_v18  ;;  %785 = vperm.xlu0 %6676, %v58_v53  }
  0x1d   :  { %5880 = vmatprep.mubr.msk.f32.mxu0 %vm68_vm1, %v32_v19  ;;  %790 = vperm.xlu1 %6677, %v59_v54  }
  0x20   :  { %5881 = vmatmul.mubr.msk.f32.gmra.mrb[12].mxu0 %vm68_vm1, %v33_v20  ;;  %775 = vperm.xlu0 %6676, %v56_v55  }
  0x21   :  { %5883 = vmatprep.mubr.msk.f32.mxu0 %vm68_vm1, %v34_v21  ;;  %780 = vperm.xlu1 %6677, %v57_v56  }
  0x24   :  { %5884 = vmatmul.mubr.msk.f32.gmra.mrb[14].mxu0 %vm68_vm1, %v35_v22  ;;  %795 = vperm.xlu0 %6676, %v60_v57  }
  0x25   :  { %5886 = vmatprep.mubr.msk.f32.mxu0 %vm68_vm1, %v36_v23  ;;  %800 = vperm.xlu1 %6677, %v61_v58  }
  0x28   :  { %5887 = vmatmul.mubr.msk.f32.gmra.mrb[16].mxu0 %vm68_vm1, %v37_v24  ;;  %1329 = vperm.xlu0 %6676, %v995_v59  }
  0x29   :  { %5889 = vmatprep.mubr.msk.f32.mxu0 %vm68_vm1, %v38_v25  ;;  %1324 = vperm.xlu1 %6677, %v994_v60  }
  0x2c   :  { %5890 = vmatmul.mubr.msk.f32.gmra.mrb[18].mxu0 %vm68_vm1, %v39_v26  ;;  %1319 = vperm.xlu0 %6676, %v993_v61  }
  0x2d   :  { %5892 = vmatprep.mubr.msk.f32.mxu0 %vm68_vm1, %v40_v27  ;;  %2235 = vperm.xlu1 %6677, %v1486_v62  }
  0x30   :  { %5893 = vmatmul.mubr.msk.f32.gmra.mrb[20].mxu0 %vm68_vm1, %v41_v28  ;;  %2240 = vperm.xlu0 %6676, %v1487_v63  }
  0x31   :  { %5895 = vmatprep.mubr.msk.f32.mxu0 %vm68_vm1, %v42_v29  ;;  %2225 = vperm.xlu1 %6677, %v1484_v0  }
  0x34   :  { %5896 = vmatmul.mubr.msk.f32.gmra.mrb[22].mxu0 %vm68_vm1, %v43_v30  ;;  %2230 = vperm.xlu0 %6676, %v1485_v1  }
  0x35   :  { %5898 = vmatprep.mubr.msk.f32.mxu0 %vm68_vm1, %v44_v31  ;;  %2245 = vperm.xlu1 %6677, %v1488_v4  }
  0x38   :  { %5899 = vmatmul.mubr.msk.f32.gmra.mrb[24].mxu0 %vm68_vm1, %v45_v32  ;;  %2250 = vperm.xlu0 %6676, %v1489_v5  }
  0x39   :  { %5901 = vmatprep.mubr.msk.f32.mxu0 %vm68_vm1, %v46_v33  ;;  %2205 = vperm.xlu1 %6677, %v1480_v6  }
  0x3c   :  { %5902 = vmatmul.mubr.msk.f32.gmra.mrb[26].mxu0 %vm68_vm1, %v47_v34  ;;  %2210 = vperm.xlu0 %6676, %v1481_v7  }
  0x3d   :  { %5904 = vmatprep.mubr.msk.f32.mxu0 %vm68_vm1, %v48_v35  ;;  %2195 = vperm.xlu1 %6677, %v1478_v8  }
  0x40   :  { %5905 = vmatmul.mubr.msk.f32.gmra.mrb[28].mxu0 %vm68_vm1, %v49_v36  ;;  %2200 = vperm.xlu0 %6676, %v1479_v9  }
  0x41   :  { %5907 = vmatprep.mubr.msk.f32.mxu0 %vm68_vm1, %v50_v37  ;;  %2215 = vperm.xlu1 %6677, %v1482_v10  }
  0x44   :  { %5908 = vmatmul.mubr.msk.f32.gmra.mrb[30].mxu0 %vm68_vm1, %v51_v38  ;;  %2220 = vperm.xlu0 %6676, %v1483_v11  }
  0x45   :  { %5910 = vmatprep.mubr.msk.f32.mxu0 %vm68_vm1, %v52_v39  ;;  %2413 = vperm.xlu1 %6677, %v2404_v12  }
  0x48   :  { %5911 = vmatmul.mubr.msk.f32.gmra.mrb[32].mxu0 %vm68_vm1, %v53_v40  ;;  %2418 = vperm.xlu0 %6676, %v2405_v14   ;;  %v17_v40 = vld [vmem:[%s7791_s1 + $0x3b0] sm:$0xff] }
  0x49   :  { %5913 = vmatprep.mubr.msk.f32.mxu0 %vm68_vm1, %v54_v41  ;;  %2408 = vperm.xlu1 %6677, %v2403_v15   ;;  %v18_v41 = vld [vmem:[%s7791_s1 + $0x3b8] sm:$0xff] }
  0x4c   :  { %5914 = vmatmul.mubr.msk.f32.gmra.mrb[34].mxu0 %vm68_vm1, %v55_v42  ;;  %v7076_v42 = vpack.c.bf16 %v18_v41, %v17_v40 }
  0x4e   :  { %6404 = vmatprep.subr.bf16.mxu1 %v7076_v42 }
  0x4f   :  { %6406 = vmatpush3.bf16.msra.mxu1 %v7076_v42 }
  0x8f   :  { %v816_v44 = vpop.permute.xlu0 %815 }
  0x90   :  { %v7082_v43 = vpop.permute.xlu1 %805 }
  0x93   :  { %v821_v47 = vpop.permute.xlu0 %820 }
  0x94   :  { %v7084_v46 = vpop.permute.xlu1 %810 }
  0x97   :  { %v7088_v49 = vpop.permute.xlu0 %825 }
  0x98   :  { %v7086_v48 = vpop.permute.xlu1 %830 }
  0x9b   :  { %v786_v54 = vpop.permute.xlu0 %785 }
  0x9c   :  { %v791_v52 = vpop.permute.xlu1 %790 }
  0xf3   :  { %v5882_v16 = vpop.f32.mrb[12].mxu0 }
  0xf4   :  { %v307_v17 = vpop.f32.mrb[13].mxu0 }
  0xf5   :  { %5920 = vmatprep.mubr.msk.f32.mxu0 %vm426_vm4, %v307_v17 }
  0xf6   :  { %5921 = vmatmul.mubr.msk.f32.vlgmr.msra.gmra.mrb[0].mxu0 %vm426_vm4, %v5882_v16 }
  0xf7   :  { %v5885_v18 = vpop.f32.mrb[14].mxu0  ;;  %6402 = vmatpush3.bf16.msra.mxu0 %v6952_v45 }
  0xf8   :  { %v317_v19 = vpop.f32.mrb[15].mxu0  ;;  %6428 = vmatprep.subr.bf16.mxu0 %v7076_v42 }
  0xf9   :  { %5923 = vmatprep.mubr.msk.f32.mxu0 %vm426_vm4, %v317_v19 }
  0xfa   :  { %5924 = vmatmul.mubr.msk.f32.gmra.mrb[2].mxu0 %vm426_vm4, %v5885_v18 }
  0xfb   :  { %v5888_v20 = vpop.f32.mrb[16].mxu0 }
  0xfc   :  { %v327_v21 = vpop.f32.mrb[17].mxu0 }
  0xfd   :  { %5926 = vmatprep.mubr.msk.f32.mxu0 %vm426_vm4, %v327_v21 }
  0xfe   :  { %5927 = vmatmul.mubr.msk.f32.gmra.mrb[4].mxu0 %vm426_vm4, %v5888_v20 }
  0xff   :  { %v5891_v22 = vpop.f32.mrb[18].mxu0 }
 0x100   :  { %v337_v23 = vpop.f32.mrb[19].mxu0 }
 0x101   :  { %5929 = vmatprep.mubr.msk.f32.mxu0 %vm426_vm4, %v337_v23 }
 0x102   :  { %5930 = vmatmul.mubr.msk.f32.gmra.mrb[6].mxu0 %vm426_vm4, %v5891_v22 }
 0x103   :  { %v5894_v24 = vpop.f32.mrb[20].mxu0 }
 0x104   :  { %v347_v25 = vpop.f32.mrb[21].mxu0 }
 0x105   :  { %5932 = vmatprep.mubr.msk.f32.mxu0 %vm426_vm4, %v347_v25  ;;  %v781_v25 = vpop.permute.xlu1 %780 }
 0x106   :  { %5933 = vmatmul.mubr.msk.f32.gmra.mrb[8].mxu0 %vm426_vm4, %v5894_v24 }
 0x107   :  { %v5897_v26 = vpop.f32.mrb[22].mxu0 }
 0x108   :  { %v357_v27 = vpop.f32.mrb[23].mxu0 }
 0x109   :  { %5935 = vmatprep.mubr.msk.f32.mxu0 %vm426_vm4, %v357_v27 }
 0x10a   :  { %5936 = vmatmul.mubr.msk.f32.gmra.mrb[10].mxu0 %vm426_vm4, %v5897_v26 }
 0x10b   :  { %v5900_v28 = vpop.f32.mrb[24].mxu0 }
 0x10c   :  { %v367_v29 = vpop.f32.mrb[25].mxu0 }
 0x10d   :  { %5942 = vmatprep.mubr.msk.f32.mxu0 %vm426_vm4, %v367_v29 }
 0x10e   :  { %5943 = vmatmul.mubr.msk.f32.vlgmr.msra.gmra.mrb[0].mxu0 %vm426_vm4, %v5900_v28  ;;  %v776_v28 = vpop.permute.xlu0 %775 }
 0x10f   :  { %v5903_v30 = vpop.f32.mrb[26].mxu0  ;;  %6430 = vmatpush3.bf16.msra.mxu0 %v7076_v42 }
 0x110   :  { %v377_v31 = vpop.f32.mrb[27].mxu0 }
 0x111   :  { %5945 = vmatprep.mubr.msk.f32.mxu0 %vm426_vm4, %v377_v31 }
 0x112   :  { %5946 = vmatmul.mubr.msk.f32.gmra.mrb[2].mxu0 %vm426_vm4, %v5903_v30  ;;  %v796_v40 = vpop.permute.xlu0 %795 }
 0x113   :  { %v5906_v32 = vpop.f32.mrb[28].mxu0 }
 0x114   :  { %v387_v33 = vpop.f32.mrb[29].mxu0 }
 0x115   :  { %5948 = vmatprep.mubr.msk.f32.mxu0 %vm426_vm4, %v387_v33 }
 0x116   :  { %5949 = vmatmul.mubr.msk.f32.gmra.mrb[4].mxu0 %vm426_vm4, %v5906_v32 }
 0x117   :  { %v5909_v34 = vpop.f32.mrb[30].mxu0 }
 0x118   :  { %v397_v35 = vpop.f32.mrb[31].mxu0 }
 0x119   :  { %5951 = vmatprep.mubr.msk.f32.mxu0 %vm426_vm4, %v397_v35  ;;  %v801_v35 = vpop.permute.xlu1 %800 }
 0x11a   :  { %5952 = vmatmul.mubr.msk.f32.gmra.mrb[6].mxu0 %vm426_vm4, %v5909_v34 }
 0x11b   :  { %v5912_v36 = vpop.f32.mrb[32].mxu0 }
 0x11c   :  { %v407_v37 = vpop.f32.mrb[33].mxu0 }
 0x11d   :  { %5954 = vmatprep.mubr.msk.f32.mxu0 %vm426_vm4, %v407_v37 }
 0x11e   :  { %5955 = vmatmul.mubr.msk.f32.gmra.mrb[8].mxu0 %vm426_vm4, %v5912_v36 }
 0x11f   :  { %v5915_v38 = vpop.f32.mrb[34].mxu0 }
 0x120   :  { %v417_v39 = vpop.f32.mrb[35].mxu0 }
 0x121   :  { %5957 = vmatprep.mubr.msk.f32.mxu0 %vm426_vm4, %v417_v39 }
 0x122   :  { %5958 = vmatmul.mubr.msk.f32.gmra.mrb[10].mxu0 %vm426_vm4, %v5915_v38 }
 0x1e1   :  { %v5944_v50 = vpop.f32.mrb[0].mxu0 }
 0x1e2   :  { %v702_v51 = vpop.f32.mrb[1].mxu0  ;;  %v834_v36 = vadd.f32 %v5944_v50, %v781_v25  ;;  %v989_v25 = vld [vmem:[%s7791_s1 + $0x1a8] sm:$0xff] }
 0x1e3   :  { %v833_v38 = vadd.f32 %v776_v28, %v702_v51  ;;  %v992_v28 = vld [vmem:[%s7791_s1 + $0x1c0] sm:$0xff] }
 0x1e5   :  { %v5947_v53 = vpop.f32.mrb[2].mxu0 }
 0x1e6   :  { %v836_v55 = vadd.f32 %v5947_v53, %v791_v52  ;;  %v712_v56 = vpop.f32.mrb[3].mxu0 }
 0x1e7   :  { %v835_v57 = vadd.f32 %v786_v54, %v712_v56 }
 0x1e8   :  { %v846_v58 = vmax.f32 %v836_v55, -30.0 }
 0x1e9   :  { %v845_v59 = vmax.f32 %v835_v57, -30.0  ;;  %v5950_v60 = vpop.f32.mrb[4].mxu0 }
 0x1ea   :  { %v848_v61 = vsub.f32 0.0, %v846_v58  ;;  %v722_v62 = vpop.f32.mrb[5].mxu0  ;;  %v838_v41 = vadd.f32 %v5950_v60, %v801_v35 }
 0x1eb   :  { %v847_v63 = vsub.f32 0.0, %v845_v59 }
 0x1ec   :  { %v851_v0 = vmul.f32 1.442695, %v848_v61 }
 0x1ed   :  { %v849_v1 = vmul.f32 1.442695, %v847_v63  ;;  %v5953_v4 = vpop.f32.mrb[6].mxu0 }
 0x1ee   :  { %6678 = vpow2.f32 %v851_v0  ;;  %v732_v5 = vpop.f32.mrb[7].mxu0  ;;  %v840_v61 = vadd.f32 %v5953_v4, %v7084_v46 }
 0x1ef   :  { %6680 = vpow2.f32 %v849_v1  ;;  %v839_v1 = vadd.f32 %v7082_v43, %v732_v5  ;;  %v6754_v43 = vmov 0.0|0.0  }
 0x1f0   :  { %6407 = vmatprep.subr.bf16.mxu1 %v6754_v43  ;;  %6431 = vmatprep.subr.bf16.mxu0 %v6754_v43 }
 0x1f1   :  { %v5956_v6 = vpop.f32.mrb[8].mxu0 }
 0x1f2   :  { %v842_v7 = vadd.f32 %v5956_v6, %v821_v47  ;;  %v742_v8 = vpop.f32.mrb[9].mxu0  ;;  %v837_v47 = vadd.f32 %v796_v40, %v722_v62 }
 0x1f3   :  { %v841_v9 = vadd.f32 %v816_v44, %v742_v8 }
 0x1f4   :  { %v870_v10 = vmax.f32 %v842_v7, -30.0 }
 0x1f5   :  { %v869_v11 = vmax.f32 %v841_v9, -30.0  ;;  %v5959_v12 = vpop.f32.mrb[10].mxu0 }
 0x1f6   :  { %v872_v14 = vsub.f32 0.0, %v870_v10  ;;  %v752_v15 = vpop.f32.mrb[11].mxu0  ;;  %v844_v0 = vadd.f32 %v5959_v12, %v7086_v48 }
 0x1f7   :  { %v871_v16 = vsub.f32 0.0, %v869_v11  ;;  %v843_v62 = vadd.f32 %v7088_v49, %v752_v15  ;;  %v7097_v11 = vld [vmem:[%s7791_s1 + $0x3c0] ss:$0 sm:$0xff]  ;;  %v6756_v49 = vmov 0.0  }
 0x1f8   :  { %v6679_v17 = vpop.eup %6678  ;;  %v875_v18 = vmul.f32 1.442695, %v872_v14 }
 0x1f9   :  { %v6681_v19 = vpop.eup %6680  ;;  %v854_v20 = vadd.f32 1.0, %v6679_v17  ;;  %v873_v21 = vmul.f32 1.442695, %v871_v16 }
 0x1fa   :  { %v853_v22 = vadd.f32 1.0, %v6681_v19  ;;  %6682 = vpow2.f32 %v875_v18 }
 0x1fb   :  { %6684 = vrcp.f32 %v854_v20 }
 0x1fc   :  { %6686 = vrcp.f32 %v853_v22 }
 0x1fd   :  { %6688 = vpow2.f32 %v873_v21  ;;  %v985_v21 = vld [vmem:[%s7791_s1 + $0x188] sm:$0xff] }
 0x204   :  { %v6683_v23 = vpop.eup %6682 }
 0x205   :  { %v6685_v24 = vpop.eup %6684  ;;  %v878_v26 = vadd.f32 1.0, %v6683_v23  ;;  %v987_v23 = vld [vmem:[%s7791_s1 + $0x198] sm:$0xff] }
 0x206   :  { %v6687_v27 = vpop.eup %6686  ;;  %v858_v29 = vmul.f32 %v6685_v24, %v854_v20  ;;  %v984_v20 = vld [vmem:[%s7791_s1 + $0x180] sm:$0xff] }
 0x207   :  { %v6689_v30 = vpop.eup %6688  ;;  %v857_v31 = vmul.f32 %v6687_v27, %v853_v22  ;;  %6690 = vrcp.f32 %v878_v26  ;;  %v986_v22 = vld [vmem:[%s7791_s1 + $0x190] sm:$0xff] }
 0x208   :  { %v860_v32 = vsub.f32 2.0, %v858_v29  ;;  %v877_v33 = vadd.f32 1.0, %v6689_v30 }
 0x209   :  { %v859_v34 = vsub.f32 2.0, %v857_v31 }
 0x20a   :  { %v862_v37 = vmul.f32 %v6685_v24, %v860_v32  ;;  %6692 = vrcp.f32 %v877_v33  ;;  %v988_v24 = vld [vmem:[%s7791_s1 + $0x1a0] sm:$0xff] }
 0x20b   :  { %v861_v39 = vmul.f32 %v6687_v27, %v859_v34  ;;  %v991_v27 = vld [vmem:[%s7791_s1 + $0x1b8] sm:$0xff] }
 0x20c   :  { %v864_v44 = vmul.f32 %v862_v37, %v834_v36 }
 0x20d   :  { %v863_v52 = vmul.f32 %v861_v39, %v833_v38 }
 0x20e   :  { %v866_v53 = vadd.f32 %v864_v44, %v838_v41 }
 0x20f   :  { %v865_v54 = vadd.f32 %v863_v52, %v837_v47 }
 0x210   :  { %v868_v4 = vmax.f32 %v866_v53, 0.0 }
 0x211   :  { %v6691_v55 = vpop.eup %6690  ;;  %v867_v5 = vmax.f32 %v865_v54, 0.0 }
 0x212   :  { %v882_v56 = vmul.f32 %v6691_v55, %v878_v26  ;;  %v898_v12 = vmul.f32 %v7097_v11, %v868_v4  ;;  %v990_v26 = vld [vmem:[%s7791_s1 + $0x1b0] sm:$0xff] }
 0x213   :  { %v897_v15 = vmul.f32 %v7097_v11, %v867_v5 }
 0x214   :  { %v6693_v57 = vpop.eup %6692  ;;  %v884_v58 = vsub.f32 2.0, %v882_v56 }
 0x215   :  { %v881_v59 = vmul.f32 %v6693_v57, %v877_v33 }
 0x216   :  { %v886_v63 = vmul.f32 %v6691_v55, %v884_v58 }
 0x217   :  { %v883_v50 = vsub.f32 2.0, %v881_v59 }
 0x218   :  { %v888_v51 = vmul.f32 %v886_v63, %v840_v61  ;;  %v1330_v61 = vpop.permute.xlu0 %1329 }
 0x219   :  { %v885_v60 = vmul.f32 %v6693_v57, %v883_v50 }
 0x21a   :  { %v890_v6 = vadd.f32 %v888_v51, %v844_v0 }
 0x21b   :  { %v887_v7 = vmul.f32 %v885_v60, %v839_v1 }
 0x21c   :  { %v892_v9 = vmax.f32 %v890_v6, 0.0  ;;  %v1320_v6 = vpop.permute.xlu0 %1319 }
 0x21d   :  { %v889_v8 = vadd.f32 %v887_v7, %v843_v62 }
 0x21e   :  { %v900_v48 = vmul.f32 %v7097_v11, %v892_v9 }
 0x21f   :  { %v891_v10 = vmax.f32 %v889_v8, 0.0 }
 0x221   :  { %v899_v46 = vmul.f32 %v7097_v11, %v891_v10 }
 0x223   :  { %5964 = vmatprep.mubr.msk.f32.mxu1 %vm426_vm4, %v899_v46 }
 0x224   :  { %5965 = vmatmul.mubr.msk.f32.vlgmr.msra.gmra.mrb[0].mxu1 %vm426_vm4, %v900_v48 }
 0x225   :  { %5971 = vmatprep.mubr.msk.f32.mxu1 %vm6755_vm5, %v6756_v49 }
 0x2f7   :  { %v5966_v14 = vpop.f32.mrb[0].mxu1 }
 0x2f8   :  { %v983_v16 = vadd.f32 %v5966_v14, %v898_v12  ;;  %v973_v17 = vpop.f32.mrb[1].mxu1 }
 0x2f9   :  { %v982_v18 = vadd.f32 %v973_v17, %v897_v15 }
 0x2fb   :  { %v6408_v19 = vpack.c.bf16 %v983_v16, %v982_v18 }
 0x2fd   :  { %6409 = vmatpush3.bf16.msra.mxu1 %v6408_v19 }
 0x2fe   :  { %6410 = vmatprep.subr.bf16.mxu1 %v6754_v43 }
 0x300   :  { %5972 = vmatmul.mubr.msk.f32.vlgmr.msra.gmra.mrb[2].mxu1 %vm426_vm4, %v984_v20 }
 0x301   :  { %5974 = vmatprep.mubr.msk.f32.mxu1 %vm6755_vm5, %v6756_v49  ;;  %6412 = vmatpush3.bf16.msra.mxu1 %v6824_v13 }
 0x302   :  { %6413 = vmatprep.subr.bf16.mxu1 %v6754_v43 }
 0x304   :  { %5975 = vmatmul.mubr.msk.f32.gmra.mrb[4].mxu1 %vm426_vm4, %v985_v21 }
 0x305   :  { %5977 = vmatprep.mubr.msk.f32.mxu1 %vm6755_vm5, %v6756_v49 }
 0x308   :  { %5978 = vmatmul.mubr.msk.f32.gmra.mrb[6].mxu1 %vm426_vm4, %v986_v22 }
 0x309   :  { %5980 = vmatprep.mubr.msk.f32.mxu1 %vm6755_vm5, %v6756_v49 }
 0x30c   :  { %5981 = vmatmul.mubr.msk.f32.gmra.mrb[8].mxu1 %vm426_vm4, %v987_v23 }
 0x30d   :  { %5983 = vmatprep.mubr.msk.f32.mxu1 %vm6755_vm5, %v6756_v49 }
 0x310   :  { %5984 = vmatmul.mubr.msk.f32.gmra.mrb[10].mxu1 %vm426_vm4, %v988_v24 }
 0x311   :  { %5986 = vmatprep.mubr.msk.f32.mxu1 %vm6755_vm5, %v6756_v49 }
 0x314   :  { %5987 = vmatmul.mubr.msk.f32.gmra.mrb[12].mxu1 %vm426_vm4, %v989_v25 }
 0x315   :  { %5989 = vmatprep.mubr.msk.f32.mxu1 %vm6755_vm5, %v6756_v49 }
 0x318   :  { %5990 = vmatmul.mubr.msk.f32.gmra.mrb[14].mxu1 %vm426_vm4, %v990_v26 }
 0x319   :  { %5992 = vmatprep.mubr.msk.f32.mxu1 %vm6755_vm5, %v6756_v49 }
 0x31c   :  { %5993 = vmatmul.mubr.msk.f32.gmra.mrb[16].mxu1 %vm426_vm4, %v991_v27  ;;  %v1325_v27 = vpop.permute.xlu1 %1324 }
 0x31d   :  { %5995 = vmatprep.mubr.msk.f32.mxu1 %vm6755_vm5, %v6756_v49 }
 0x320   :  { %5996 = vmatmul.mubr.msk.f32.gmra.mrb[18].mxu1 %vm426_vm4, %v992_v28 }
 0x321   :  { %6002 = vmatprep.mubr.msk.f32.mxu1 %vm6755_vm5, %v6756_v49 }
 0x3d3   :  { %v1089_v29 = vpop.f32.mrb[2].mxu1 }
 0x3d4   :  { %v5973_v30 = vpop.f32.mrb[3].mxu1 }
 0x3d7   :  { %v1094_v31 = vpop.f32.mrb[4].mxu1 }
 0x3d8   :  { %v5976_v32 = vpop.f32.mrb[5].mxu1 }
 0x3db   :  { %v1099_v33 = vpop.f32.mrb[6].mxu1 }
 0x3dc   :  { %v5979_v34 = vpop.f32.mrb[7].mxu1 }
 0x3df   :  { %v1104_v35 = vpop.f32.mrb[8].mxu1 }
 0x3e0   :  { %v5982_v36 = vpop.f32.mrb[9].mxu1  ;;  %6003 = vmatmul.mubr.msk.f32.vlgmr.msra.gmra.mrb[20].mxu1 %vm426_vm4, %v1104_v35 }
 0x3e1   :  { %6005 = vmatprep.mubr.msk.f32.mxu1 %vm6755_vm5, %v6756_v49  ;;  %6415 = vmatpush3.bf16.msra.mxu1 %v6952_v45 }
 0x3e2   :  { %6416 = vmatprep.subr.bf16.mxu1 %v6754_v43 }
 0x3e3   :  { %v1109_v37 = vpop.f32.mrb[10].mxu1 }
 0x3e4   :  { %v5985_v38 = vpop.f32.mrb[11].mxu1  ;;  %6006 = vmatmul.mubr.msk.f32.gmra.mrb[22].mxu1 %vm426_vm4, %v1109_v37 }
 0x3e5   :  { %6008 = vmatprep.mubr.msk.f32.mxu1 %vm6755_vm5, %v6756_v49 }
 0x3e7   :  { %v1114_v39 = vpop.f32.mrb[12].mxu1 }
 0x3e8   :  { %v5988_v40 = vpop.f32.mrb[13].mxu1  ;;  %6009 = vmatmul.mubr.msk.f32.gmra.mrb[24].mxu1 %vm426_vm4, %v1114_v39 }
 0x3e9   :  { %6015 = vmatprep.mubr.msk.f32.mxu1 %vm6755_vm5, %v6756_v49  ;;  %v1442_v40 = vld [vmem:[%s7791_s1 + $0x1e0] sm:$0xff] }
 0x3eb   :  { %v1119_v41 = vpop.f32.mrb[14].mxu1 }
 0x3ec   :  { %v5991_v44 = vpop.f32.mrb[15].mxu1  ;;  %6016 = vmatmul.mubr.msk.f32.vlgmr.msra.gmra.mrb[26].mxu1 %vm426_vm4, %v1119_v41 }
 0x3ed   :  { %6018 = vmatprep.mubr.msk.f32.mxu1 %vm6755_vm5, %v6756_v49  ;;  %6418 = vmatpush3.bf16.msra.mxu1 %v7076_v42 }
 0x3ef   :  { %v1124_v47 = vpop.f32.mrb[16].mxu1 }
 0x3f0   :  { %v5994_v52 = vpop.f32.mrb[17].mxu1  ;;  %6019 = vmatmul.mubr.msk.f32.gmra.mrb[28].mxu1 %vm426_vm4, %v1124_v47 }
 0x3f1   :  { %6021 = vmatprep.mubr.msk.f32.mxu1 %vm6755_vm5, %v6756_v49 }
 0x3f3   :  { %v1129_v53 = vpop.f32.mrb[18].mxu1 }
 0x3f4   :  { %v5997_v54 = vpop.f32.mrb[19].mxu1  ;;  %6022 = vmatmul.mubr.msk.f32.gmra.mrb[30].mxu1 %vm426_vm4, %v1129_v53 }
 0x3f5   :  { %6028 = vmatprep.mubr.msk.f32.mxu1 %vm6755_vm5, %v6756_v49  ;;  %v1443_v54 = vld [vmem:[%s7791_s1 + $0x1e8] sm:$0xff] }
 0x4b3   :  { %v1208_v55 = vpop.f32.mrb[20].mxu1 }
 0x4b4   :  { %v1222_v56 = vadd.f32 %v1208_v55, %v1089_v29  ;;  %v6004_v57 = vpop.f32.mrb[21].mxu1  ;;  %v1444_v55 = vld [vmem:[%s7791_s1 + $0x1f0] sm:$0xff] }
 0x4b5   :  { %v1446_v57 = vld [vmem:[%s7791_s1 + $0x200] sm:$0xff] }
 0x4b7   :  { %v1213_v58 = vpop.f32.mrb[22].mxu1 }
 0x4b8   :  { %v1223_v59 = vadd.f32 %v1213_v58, %v1094_v31  ;;  %v6007_v42 = vpop.f32.mrb[23].mxu1  ;;  %v1447_v58 = vld [vmem:[%s7791_s1 + $0x208] sm:$0xff] }
 0x4b9   :  { %v1450_v42 = vld [vmem:[%s7791_s1 + $0x220] sm:$0xff] }
 0x4bb   :  { %v1218_v63 = vpop.f32.mrb[24].mxu1 }
 0x4bc   :  { %v1224_v50 = vadd.f32 %v1218_v63, %v1099_v33  ;;  %v6010_v0 = vpop.f32.mrb[25].mxu1  ;;  %v1452_v63 = vld [vmem:[%s7791_s1 + $0x230] sm:$0xff] }
 0x4bd   :  { %v1454_v0 = vld [vmem:[%s7791_s1 + $0x240] sm:$0xff] }
 0x4bf   :  { %v1300_v51 = vpop.f32.mrb[26].mxu1 }
 0x4c0   :  { %v1314_v1 = vadd.f32 %v1300_v51, %v1222_v56  ;;  %v6017_v60 = vpop.f32.mrb[27].mxu1  ;;  %v1445_v56 = vld [vmem:[%s7791_s1 + $0x1f8] sm:$0xff]  ;;  %v1455_v51 = vld [vmem:[%s7791_s1 + $0x248] sm:$0xff] }
 0x4c1   :  { %v1457_v60 = vld [vmem:[%s7791_s1 + $0x258] sm:$0xff] }
 0x4c2   :  { %v1332_v62 = vadd.f32 %v1320_v6, %v1314_v1  ;;  %v1456_v1 = vld [vmem:[%s7791_s1 + $0x250] sm:$0xff]  ;;  %v1458_v6 = vld [vmem:[%s7791_s1 + $0x260] sm:$0xff] }
 0x4c3   :  { %v1305_v7 = vpop.f32.mrb[28].mxu1 }
 0x4c4   :  { %v1335_v8 = vmax.f32 %v1332_v62, -30.0  ;;  %v1315_v9 = vadd.f32 %v1305_v7, %v1223_v59  ;;  %v6020_v10 = vpop.f32.mrb[29].mxu1  ;;  %v1448_v59 = vld [vmem:[%s7791_s1 + $0x210] sm:$0xff] }
 0x4c5   :  { %v1460_v7 = vld [vmem:[%s7791_s1 + $0x270] sm:$0xff]  ;;  %v1463_v10 = vld [vmem:[%s7791_s1 + $0x288] sm:$0xff] }
 0x4c6   :  { %v1336_v46 = vsub.f32 0.0, %v1335_v8  ;;  %v1333_v29 = vadd.f32 %v1325_v27, %v1315_v9  ;;  %v1461_v8 = vld [vmem:[%s7791_s1 + $0x278] sm:$0xff]  ;;  %v1462_v9 = vld [vmem:[%s7791_s1 + $0x280] sm:$0xff] }
 0x4c7   :  { %v1310_v48 = vpop.f32.mrb[30].mxu1 }
 0x4c8   :  { %v1337_v43 = vmul.f32 1.442695, %v1336_v46  ;;  %v1316_v4 = vadd.f32 %v1310_v48, %v1224_v50  ;;  %v6023_v5 = vpop.f32.mrb[31].mxu1  ;;  %v1453_v50 = vld [vmem:[%s7791_s1 + $0x238] sm:$0xff]  ;;  %v1464_v46 = vld [vmem:[%s7791_s1 + $0x290] sm:$0xff] }
 0x4c9   :  { %v1465_v48 = vld [vmem:[%s7791_s1 + $0x298] sm:$0xff]  ;;  %v1468_v5 = vld [vmem:[%s7791_s1 + $0x2b0] sm:$0xff] }
 0x4ca   :  { %6694 = vpow2.f32 %v1337_v43  ;;  %v1334_v12 = vadd.f32 %v1330_v61, %v1316_v4  ;;  %v1451_v61 = vld [vmem:[%s7791_s1 + $0x228] sm:$0xff]  ;;  %v1466_v43 = vld [vmem:[%s7791_s1 + $0x2a0] sm:$0xff] }
 0x4cb   :  { %v1467_v4 = vld [vmem:[%s7791_s1 + $0x2a8] sm:$0xff] }
 0x4cc   :  { %v1350_v14 = vmax.f32 %v1334_v12, -30.0 }
 0x4ce   :  { %v1351_v15 = vsub.f32 0.0, %v1350_v14  ;;  %v1470_v14 = vld [vmem:[%s7791_s1 + $0x2c0] sm:$0xff] }
 0x4d0   :  { %v1352_v16 = vmul.f32 1.442695, %v1351_v15  ;;  %v1471_v15 = vld [vmem:[%s7791_s1 + $0x2c8] sm:$0xff] }
 0x4d2   :  { %6696 = vpow2.f32 %v1352_v16  ;;  %v1472_v16 = vld [vmem:[%s7791_s1 + $0x2d0] sm:$0xff] }
 0x4d4   :  { %v6695_v17 = vpop.eup %6694 }
 0x4d5   :  { %v1339_v18 = vadd.f32 1.0, %v6695_v17  ;;  %v1473_v17 = vld [vmem:[%s7791_s1 + $0x2d8] sm:$0xff] }
 0x4d7   :  { %6698 = vrcp.f32 %v1339_v18 }
 0x4dc   :  { %v6697_v19 = vpop.eup %6696 }
 0x4dd   :  { %v1354_v20 = vadd.f32 1.0, %v6697_v19  ;;  %v1475_v19 = vld [vmem:[%s7791_s1 + $0x2e8] sm:$0xff] }
 0x4df   :  { %6700 = vrcp.f32 %v1354_v20 }
 0x4e1   :  { %v6699_v21 = vpop.eup %6698 }
 0x4e2   :  { %v1341_v22 = vmul.f32 %v6699_v21, %v1339_v18  ;;  %v1474_v18 = vld [vmem:[%s7791_s1 + $0x2e0] sm:$0xff] }
 0x4e4   :  { %v1342_v23 = vsub.f32 2.0, %v1341_v22 }
 0x4e6   :  { %v1343_v24 = vmul.f32 %v6699_v21, %v1342_v23  ;;  %v1477_v21 = vld [vmem:[%s7791_s1 + $0x2f8] sm:$0xff] }
 0x4e8   :  { %v1345_v25 = vrot.slane %v1343_v24, 4 }
 0x4e9   :  { %v6701_v26 = vpop.eup %6700 }
 0x4ea   :  { %v1347_v28 = vmul.f32 %v1345_v25, %v1332_v62  ;;  %v1356_v30 = vmul.f32 %v6701_v26, %v1354_v20  ;;  %v1459_v62 = vld [vmem:[%s7791_s1 + $0x268] sm:$0xff]  ;;  %v1476_v20 = vld [vmem:[%s7791_s1 + $0x2f0] sm:$0xff] }
 0x4ec   :  { %v1348_v31 = vadd.f32 %v1347_v28, %v1333_v29  ;;  %v1357_v32 = vsub.f32 2.0, %v1356_v30 }
 0x4ee   :  { %v1358_v33 = vmul.f32 %v6701_v26, %v1357_v32  ;;  %v1349_v41 = vmax.f32 %v1348_v31, 0.0 }
 0x4f0   :  { %v1360_v34 = vrot.slane %v1358_v33, 4  ;;  %v1365_v44 = vmul.f32 %v7097_v11, %v1349_v41 }
 0x4f2   :  { %v1362_v35 = vmul.f32 %v1360_v34, %v1333_v29 }
 0x4f4   :  { %v1363_v36 = vadd.f32 %v1362_v35, %v1334_v12  ;;  %v1469_v12 = vld [vmem:[%s7791_s1 + $0x2b8] sm:$0xff] }
 0x4f6   :  { %v1364_v37 = vmax.f32 %v1363_v36, 0.0 }
 0x4f8   :  { %v1366_v38 = vmul.f32 %v7097_v11, %v1364_v37 }
 0x4fa   :  { %v1368_v39 = vrot.slane %v1366_v38, 4 }
 0x4fc   :  { %6029 = vmatmul.mubr.msk.f32.vlgmr.msra.gmra.mrb[32].mxu1 %vm426_vm4, %v1368_v39 }
 0x4fd   :  { %6033 = vmatprep.mubr.msk.f32.mxu1 %vm1490_vm6, %v1442_v40 }
 0x5cf   :  { %v1437_v47 = vpop.f32.mrb[32].mxu1 }
 0x5d0   :  { %v1441_v52 = vadd.f32 %v1437_v47, %v1365_v44  ;;  %v6030_v53 = vpop.f32.mrb[33].mxu1 }
 0x5d1   :  { %v2241_v53 = vpop.permute.xlu0 %2240 }
 0x5d2   :  { %6031 = vmatprep.subr.msk.mxu1 %vm177_vm0, %v1441_v52 }
 0x5d3   :  { %6032 = vmatpush3.msk.msra.mxu1 %vm177_vm0, %v1441_v52 }
 0x5d4   :  { %6034 = vmatmul.mubr.msk.f32.vlgmr.msra.gmra.mrb[34].mxu1 %vm1490_vm6, %v1443_v54  ;;  %6420 = vmatprep.subr.bf16.mxu1 %v6824_v13  ;;  %v2236_v54 = vpop.permute.xlu1 %2235 }
 0x5d5   :  { %6036 = vmatprep.mubr.msk.f32.mxu1 %vm1490_vm6, %v1444_v55  ;;  %6422 = vmatpush3.bf16.msra.mxu1 %v6824_v13  ;;  %v1449_v13 = vld [vmem:[%s7791_s1 + $0x218] sm:$0xff]  ;;  %v7359_v55 = vpop.permute.xlu0 %2230 }
 0x5d6   :  { %6424 = vmatprep.subr.bf16.mxu1 %v6952_v45 }
 0x5d8   :  { %6037 = vmatmul.mubr.msk.f32.gmra.mrb[36].mxu1 %vm1490_vm6, %v1445_v56  ;;  %v7361_v56 = vpop.permute.xlu1 %2225 }
 0x5d9   :  { %6039 = vmatprep.mubr.msk.f32.mxu1 %vm1490_vm6, %v1446_v57  ;;  %v7363_v57 = vpop.permute.xlu0 %2250 }
 0x5dc   :  { %6040 = vmatmul.mubr.msk.f32.gmra.mrb[38].mxu1 %vm1490_vm6, %v1447_v58  ;;  %v7365_v58 = vpop.permute.xlu1 %2245 }
 0x5dd   :  { %6042 = vmatprep.mubr.msk.f32.mxu1 %vm1490_vm6, %v1448_v59 }
 0x5e0   :  { %6043 = vmatmul.mubr.msk.f32.gmra.mrb[40].mxu1 %vm1490_vm6, %v1449_v13 }
 0x5e1   :  { %6045 = vmatprep.mubr.msk.f32.mxu1 %vm1490_vm6, %v1450_v42  ;;  %v2211_v42 = vpop.permute.xlu0 %2210 }
 0x5e4   :  { %6046 = vmatmul.mubr.msk.f32.gmra.mrb[42].mxu1 %vm1490_vm6, %v1451_v61 }
 0x5e5   :  { %6048 = vmatprep.mubr.msk.f32.mxu1 %vm1490_vm6, %v1452_v63  ;;  %v2206_v63 = vpop.permute.xlu1 %2205 }
 0x5e8   :  { %6049 = vmatmul.mubr.msk.f32.gmra.mrb[44].mxu1 %vm1490_vm6, %v1453_v50 }
 0x5e9   :  { %6051 = vmatprep.mubr.msk.f32.mxu1 %vm1490_vm6, %v1454_v0 }
 0x5ec   :  { %6052 = vmatmul.mubr.msk.f32.gmra.mrb[46].mxu1 %vm1490_vm6, %v1455_v51 }
 0x5ed   :  { %6054 = vmatprep.mubr.msk.f32.mxu1 %vm1490_vm6, %v1456_v1 }
 0x5f0   :  { %6055 = vmatmul.mubr.msk.f32.gmra.mrb[48].mxu1 %vm1490_vm6, %v1457_v60 }
 0x5f1   :  { %6057 = vmatprep.mubr.msk.f32.mxu1 %vm1490_vm6, %v1458_v6 }
 0x5f4   :  { %6058 = vmatmul.mubr.msk.f32.gmra.mrb[50].mxu1 %vm1490_vm6, %v1459_v62 }
 0x5f5   :  { %6060 = vmatprep.mubr.msk.f32.mxu1 %vm1490_vm6, %v1460_v7 }
 0x5f8   :  { %6061 = vmatmul.mubr.msk.f32.gmra.mrb[52].mxu1 %vm1490_vm6, %v1461_v8 }
 0x5f9   :  { %6063 = vmatprep.mubr.msk.f32.mxu1 %vm1490_vm6, %v1462_v9 }
 0x5fc   :  { %6064 = vmatmul.mubr.msk.f32.gmra.mrb[54].mxu1 %vm1490_vm6, %v1463_v10 }
 0x5fd   :  { %6066 = vmatprep.mubr.msk.f32.mxu1 %vm1490_vm6, %v1464_v46 }
 0x600   :  { %6067 = vmatmul.mubr.msk.f32.gmra.mrb[56].mxu1 %vm1490_vm6, %v1465_v48 }
 0x601   :  { %6069 = vmatprep.mubr.msk.f32.mxu1 %vm1490_vm6, %v1466_v43 }
 0x604   :  { %6070 = vmatmul.mubr.msk.f32.gmra.mrb[58].mxu1 %vm1490_vm6, %v1467_v4 }
 0x605   :  { %6072 = vmatprep.mubr.msk.f32.mxu1 %vm1490_vm6, %v1468_v5 }
 0x608   :  { %6073 = vmatmul.mubr.msk.f32.gmra.mrb[60].mxu1 %vm1490_vm6, %v1469_v12 }
 0x609   :  { %6075 = vmatprep.mubr.msk.f32.mxu1 %vm1490_vm6, %v1470_v14 }
 0x60c   :  { %6076 = vmatmul.mubr.msk.f32.gmra.mrb[62].mxu1 %vm1490_vm6, %v1471_v15 }
 0x60d   :  { %6078 = vmatprep.mubr.msk.f32.mxu1 %vm1490_vm6, %v1472_v16 }
 0x610   :  { %6079 = vmatmul.mubr.msk.f32.gmra.mrb[64].mxu1 %vm1490_vm6, %v1473_v17 }
 0x611   :  { %6081 = vmatprep.mubr.msk.f32.mxu1 %vm1490_vm6, %v1474_v18 }
 0x614   :  { %6082 = vmatmul.mubr.msk.f32.gmra.mrb[66].mxu1 %vm1490_vm6, %v1475_v19 }
 0x615   :  { %6084 = vmatprep.mubr.msk.f32.mxu1 %vm1490_vm6, %v1476_v20 }
 0x618   :  { %6085 = vmatmul.mubr.msk.f32.gmra.mrb[68].mxu1 %vm1490_vm6, %v1477_v21 }
 0x6bf   :  { %v6053_v22 = vpop.f32.mrb[46].mxu1 }
 0x6c0   :  { %v1728_v23 = vpop.f32.mrb[47].mxu1 }
 0x6c1   :  { %6091 = vmatprep.mubr.msk.f32.mxu1 %vm426_vm4, %v1728_v23 }
 0x6c2   :  { %6092 = vmatmul.mubr.msk.f32.vlgmr.msra.gmra.mrb[34].mxu1 %vm426_vm4, %v6053_v22 }
 0x6c3   :  { %v6056_v24 = vpop.f32.mrb[48].mxu1  ;;  %6426 = vmatpush3.bf16.msra.mxu1 %v6952_v45 }
 0x6c4   :  { %v1738_v25 = vpop.f32.mrb[49].mxu1 }
 0x6c5   :  { %6094 = vmatprep.mubr.msk.f32.mxu1 %vm426_vm4, %v1738_v25 }
 0x6c6   :  { %6095 = vmatmul.mubr.msk.f32.gmra.mrb[36].mxu1 %vm426_vm4, %v6056_v24 }
 0x6c7   :  { %v6059_v26 = vpop.f32.mrb[50].mxu1 }
 0x6c8   :  { %v1748_v27 = vpop.f32.mrb[51].mxu1 }
 0x6c9   :  { %6097 = vmatprep.mubr.msk.f32.mxu1 %vm426_vm4, %v1748_v27 }
 0x6ca   :  { %6098 = vmatmul.mubr.msk.f32.gmra.mrb[38].mxu1 %vm426_vm4, %v6059_v26 }
 0x6cb   :  { %v6062_v28 = vpop.f32.mrb[52].mxu1 }
 0x6cc   :  { %v1758_v29 = vpop.f32.mrb[53].mxu1 }
 0x6cd   :  { %6100 = vmatprep.mubr.msk.f32.mxu1 %vm426_vm4, %v1758_v29 }
 0x6ce   :  { %6101 = vmatmul.mubr.msk.f32.gmra.mrb[40].mxu1 %vm426_vm4, %v6062_v28  ;;  %v2201_v28 = vpop.permute.xlu0 %2200 }
 0x6cf   :  { %v6065_v30 = vpop.f32.mrb[54].mxu1 }
 0x6d0   :  { %v1768_v31 = vpop.f32.mrb[55].mxu1 }
 0x6d1   :  { %6103 = vmatprep.mubr.msk.f32.mxu1 %vm426_vm4, %v1768_v31  ;;  %v2196_v31 = vpop.permute.xlu1 %2195 }
 0x6d2   :  { %6104 = vmatmul.mubr.msk.f32.gmra.mrb[42].mxu1 %vm426_vm4, %v6065_v30 }
 0x6d3   :  { %v6068_v45 = vpop.f32.mrb[56].mxu1 }
 0x6d4   :  { %v1778_v32 = vpop.f32.mrb[57].mxu1 }
 0x6d5   :  { %6106 = vmatprep.mubr.msk.f32.mxu1 %vm426_vm4, %v1778_v32 }
 0x6d6   :  { %6107 = vmatmul.mubr.msk.f32.gmra.mrb[44].mxu1 %vm426_vm4, %v6068_v45 }
 0x6d7   :  { %v6071_v33 = vpop.f32.mrb[58].mxu1 }
 0x6d8   :  { %v1788_v34 = vpop.f32.mrb[59].mxu1 }
 0x6d9   :  { %6113 = vmatprep.mubr.msk.f32.mxu1 %vm426_vm4, %v1788_v34 }
 0x6da   :  { %6114 = vmatmul.mubr.msk.f32.vlgmr.msra.gmra.mrb[34].mxu1 %vm426_vm4, %v6071_v33 }
 0x6db   :  { %v6074_v35 = vpop.f32.mrb[60].mxu1 }
 0x6dc   :  { %v1798_v36 = vpop.f32.mrb[61].mxu1 }
 0x6dd   :  { %6116 = vmatprep.mubr.msk.f32.mxu1 %vm426_vm4, %v1798_v36 }
 0x6de   :  { %6117 = vmatmul.mubr.msk.f32.gmra.mrb[36].mxu1 %vm426_vm4, %v6074_v35 }
 0x6df   :  { %v6077_v37 = vpop.f32.mrb[62].mxu1 }
 0x6e0   :  { %v1808_v38 = vpop.f32.mrb[63].mxu1 }
 0x6e1   :  { %6119 = vmatprep.mubr.msk.f32.mxu1 %vm426_vm4, %v1808_v38 }
 0x6e2   :  { %6120 = vmatmul.mubr.msk.f32.gmra.mrb[38].mxu1 %vm426_vm4, %v6077_v37 }
 0x6e3   :  { %v6080_v39 = vpop.f32.mrb[64].mxu1 }
 0x6e4   :  { %v1818_v40 = vpop.f32.mrb[65].mxu1 }
 0x6e5   :  { %6122 = vmatprep.mubr.msk.f32.mxu1 %vm426_vm4, %v1818_v40 }
 0x6e6   :  { %6123 = vmatmul.mubr.msk.f32.gmra.mrb[40].mxu1 %vm426_vm4, %v6080_v39  ;;  %v2221_v39 = vpop.permute.xlu0 %2220 }
 0x6e7   :  { %v6083_v41 = vpop.f32.mrb[66].mxu1 }
 0x6e8   :  { %v1828_v44 = vpop.f32.mrb[67].mxu1 }
 0x6e9   :  { %6125 = vmatprep.mubr.msk.f32.mxu1 %vm426_vm4, %v1828_v44  ;;  %v2216_v44 = vpop.permute.xlu1 %2215 }
 0x6ea   :  { %6126 = vmatmul.mubr.msk.f32.gmra.mrb[42].mxu1 %vm426_vm4, %v6083_v41 }
 0x6eb   :  { %v6086_v47 = vpop.f32.mrb[68].mxu1 }
 0x6ec   :  { %v1838_v52 = vpop.f32.mrb[69].mxu1 }
 0x6ed   :  { %6128 = vmatprep.mubr.msk.f32.mxu1 %vm426_vm4, %v1838_v52 }
 0x6ee   :  { %6129 = vmatmul.mubr.msk.f32.gmra.mrb[44].mxu1 %vm426_vm4, %v6086_v47 }
 0x7ad   :  { %v6115_v59 = vpop.f32.mrb[34].mxu1 }
 0x7ae   :  { %v2122_v13 = vpop.f32.mrb[35].mxu1  ;;  %v2254_v37 = vadd.f32 %v6115_v59, %v2201_v28 }
 0x7af   :  { %v2253_v40 = vadd.f32 %v2196_v31, %v2122_v13 }
 0x7b1   :  { %v6118_v61 = vpop.f32.mrb[36].mxu1 }
 0x7b2   :  { %v2256_v50 = vadd.f32 %v6118_v61, %v2211_v42  ;;  %v2132_v0 = vpop.f32.mrb[37].mxu1 }
 0x7b3   :  { %v2255_v51 = vadd.f32 %v2206_v63, %v2132_v0 }
 0x7b4   :  { %v2266_v1 = vmax.f32 %v2256_v50, -30.0 }
 0x7b5   :  { %v2265_v60 = vmax.f32 %v2255_v51, -30.0  ;;  %v6121_v6 = vpop.f32.mrb[38].mxu1 }
 0x7b6   :  { %v2268_v62 = vsub.f32 0.0, %v2266_v1  ;;  %v2142_v7 = vpop.f32.mrb[39].mxu1  ;;  %v2258_v47 = vadd.f32 %v6121_v6, %v2221_v39 }
 0x7b7   :  { %v2267_v8 = vsub.f32 0.0, %v2265_v60 }
 0x7b8   :  { %v2271_v9 = vmul.f32 1.442695, %v2268_v62 }
 0x7b9   :  { %v2269_v10 = vmul.f32 1.442695, %v2267_v8  ;;  %v6124_v46 = vpop.f32.mrb[40].mxu1 }
 0x7ba   :  { %6702 = vpow2.f32 %v2271_v9  ;;  %v2152_v48 = vpop.f32.mrb[41].mxu1  ;;  %v2260_v60 = vadd.f32 %v6124_v46, %v7359_v55 }
 0x7bb   :  { %6704 = vpow2.f32 %v2269_v10  ;;  %v2259_v9 = vadd.f32 %v7361_v56, %v2152_v48 }
 0x7bd   :  { %v6127_v43 = vpop.f32.mrb[42].mxu1 }
 0x7be   :  { %v2262_v4 = vadd.f32 %v6127_v43, %v2241_v53  ;;  %v2162_v5 = vpop.f32.mrb[43].mxu1  ;;  %v2257_v53 = vadd.f32 %v2216_v44, %v2142_v7  ;;  %v3009_v44 = vld [vmem:[%s7791_s1 + $0x458] sm:$0xff] }
 0x7bf   :  { %v2261_v12 = vadd.f32 %v2236_v54, %v2162_v5 }
 0x7c0   :  { %v2290_v14 = vmax.f32 %v2262_v4, -30.0 }
 0x7c1   :  { %v2289_v15 = vmax.f32 %v2261_v12, -30.0  ;;  %v6130_v16 = vpop.f32.mrb[44].mxu1 }
 0x7c2   :  { %v2292_v17 = vsub.f32 0.0, %v2290_v14  ;;  %v2172_v18 = vpop.f32.mrb[45].mxu1  ;;  %v2264_v8 = vadd.f32 %v6130_v16, %v7363_v57 }
 0x7c3   :  { %v2291_v19 = vsub.f32 0.0, %v2289_v15  ;;  %v2263_v7 = vadd.f32 %v7365_v58, %v2172_v18 }
 0x7c4   :  { %v6703_v20 = vpop.eup %6702  ;;  %v2295_v21 = vmul.f32 1.442695, %v2292_v17 }
 0x7c5   :  { %v6705_v22 = vpop.eup %6704  ;;  %v2274_v23 = vadd.f32 1.0, %v6703_v20  ;;  %v2293_v24 = vmul.f32 1.442695, %v2291_v19  ;;  %v2400_v19 = vld [vmem:[%s7791_s1 + $0x360] sm:$0xff]  ;;  %v2402_v20 = vld [vmem:[%s7791_s1 + $0x370] sm:$0xff] }
 0x7c6   :  { %v2273_v25 = vadd.f32 1.0, %v6705_v22  ;;  %6706 = vpow2.f32 %v2295_v21  ;;  %v2512_v21 = vld [vmem:[%s7791_s1 + $0x3c8] sm:$0xff]  ;;  %v2513_v22 = vld [vmem:[%s7791_s1 + $0x3d0] sm:$0xf] }
 0x7c7   :  { %6708 = vrcp.f32 %v2274_v23 }
 0x7c8   :  { %6710 = vrcp.f32 %v2273_v25 }
 0x7c9   :  { %6712 = vpow2.f32 %v2293_v24 }
 0x7d0   :  { %v6707_v26 = vpop.eup %6706 }
 0x7d1   :  { %v6709_v27 = vpop.eup %6708  ;;  %v2298_v29 = vadd.f32 1.0, %v6707_v26  ;;  %v2511_v26 = vld [vmem:[%s7791_s1 + $0x430] sm:$0xff] }
 0x7d2   :  { %v6711_v30 = vpop.eup %6710  ;;  %v2278_v45 = vmul.f32 %v6709_v27, %v2274_v23  ;;  %v2596_v23 = vld [vmem:[%s7791_s1 + $0x440] sm:$0xff] }
 0x7d3   :  { %v6713_v32 = vpop.eup %6712  ;;  %v2277_v33 = vmul.f32 %v6711_v30, %v2273_v25  ;;  %6714 = vrcp.f32 %v2298_v29  ;;  %v2510_v25 = vld [vmem:[%s7791_s1 + $0x428] sm:$0xff] }
 0x7d4   :  { %v2280_v34 = vsub.f32 2.0, %v2278_v45  ;;  %v2297_v35 = vadd.f32 1.0, %v6713_v32 }
 0x7d5   :  { %v2279_v36 = vsub.f32 2.0, %v2277_v33 }
 0x7d6   :  { %v2282_v38 = vmul.f32 %v6709_v27, %v2280_v34  ;;  %6716 = vrcp.f32 %v2297_v35  ;;  %v6444_v27 = vpack.c.bf16 %v2511_v26, %v2510_v25  ;;  %v3612_v25 = vld [vmem:[%s7791_s1 + $0x4a8] sm:$0xf]  ;;  %v3863_v26 = vld [vmem:[%s7791_s1 + $0x4b0] sm:$0xff] }
 0x7d7   :  { %v2281_v41 = vmul.f32 %v6711_v30, %v2279_v36  ;;  %v2841_v36 = vld [vmem:[%s7791_s1 + $0x448] sm:$0xff] }
 0x7d8   :  { %v2284_v52 = vmul.f32 %v2282_v38, %v2254_v37  ;;  %v2842_v37 = vld [vmem:[%s7791_s1 + $0x450] sm:$0xff]  ;;  %v2758_v38 = vld [vmem:[%s7791_s1 + $0x3d8] sm:$0xff] }
 0x7d9   :  { %v2283_v54 = vmul.f32 %v2281_v41, %v2253_v40  ;;  %v6454_v39 = vpack.c.bf16 %v2842_v37, %v2841_v36  ;;  %v6751_v40 = vld [vmem:[%s7790_s0 + $0x8] sm:$0xf]  ;;  %v2759_v41 = vld [vmem:[%s7791_s1 + $0x3e0] sm:$0xf]  ;;  %v3609_v37 = vld [vmem:[%s7791_s1 + $0x4f0] sm:$0xff] }
 0x7da   :  { %v2286_v42 = vadd.f32 %v2284_v52, %v2258_v47  ;;  %v3010_v47 = vld [vmem:[%s7791_s1 + $0x460] sm:$0xff] }
 0x7db   :  { %v2285_v61 = vadd.f32 %v2283_v54, %v2257_v53  ;;  %v2926_v54 = vld [vmem:[%s7791_s1 + $0x3e8] sm:$0xff] }
 0x7dc   :  { %v2288_v55 = vmax.f32 %v2286_v42, 0.0  ;;  %v6464_v42 = vpack.c.bf16 %v3010_v47, %v3009_v44  ;;  %v3946_v44 = vld [vmem:[%s7791_s1 + $0x520] sm:$0xff]  ;;  %v3947_v47 = vld [vmem:[%s7791_s1 + $0x528] sm:$0xff] }
 0x7dd   :  { %v6715_v63 = vpop.eup %6714  ;;  %v2287_v56 = vmax.f32 %v2285_v61, 0.0  ;;  %v2927_v61 = vld [vmem:[%s7791_s1 + $0x3f0] sm:$0xf] }
 0x7de   :  { %v2302_v50 = vmul.f32 %v6715_v63, %v2298_v29  ;;  %v2314_v57 = vmul.f32 %v7097_v11, %v2288_v55  ;;  %v3431_v55 = vld [vmem:[%s7791_s1 + $0x420] sm:$0xf] }
 0x7df   :  { %v2313_v46 = vmul.f32 %v7097_v11, %v2287_v56 }
 0x7e0   :  { %v6717_v0 = vpop.eup %6716  ;;  %v2304_v51 = vsub.f32 2.0, %v2302_v50  ;;  %v3178_v50 = vld [vmem:[%s7791_s1 + $0x470] sm:$0xff] }
 0x7e1   :  { %v2301_v1 = vmul.f32 %v6717_v0, %v2297_v35  ;;  %v6750_v35 = vld [vmem:[%s7790_s0] sm:$0xff] }
 0x7e2   :  { %v2306_v59 = vmul.f32 %v6715_v63, %v2304_v51  ;;  %v3177_v63 = vld [vmem:[%s7791_s1 + $0x468] sm:$0xff] }
 0x7e3   :  { %v2303_v62 = vsub.f32 2.0, %v2301_v1  ;;  %v3094_v1 = vld [vmem:[%s7791_s1 + $0x3f8] sm:$0xff] }
 0x7e4   :  { %v2308_v13 = vmul.f32 %v2306_v59, %v2260_v60  ;;  %v6474_v60 = vpack.c.bf16 %v3178_v50, %v3177_v63  ;;  %v3095_v59 = vld [vmem:[%s7791_s1 + $0x400] sm:$0xf] }
 0x7e5   :  { %v2305_v6 = vmul.f32 %v6717_v0, %v2303_v62  ;;  %v3345_v62 = vld [vmem:[%s7791_s1 + $0x478] sm:$0xff] }
 0x7e6   :  { %v2310_v10 = vadd.f32 %v2308_v13, %v2264_v8  ;;  %v3346_v8 = vld [vmem:[%s7791_s1 + $0x480] sm:$0xff] }
 0x7e7   :  { %v2307_v43 = vmul.f32 %v2305_v6, %v2259_v9  ;;  %v3262_v6 = vld [vmem:[%s7791_s1 + $0x408] sm:$0xff] }
 0x7e8   :  { %v2312_v5 = vmax.f32 %v2310_v10, 0.0  ;;  %v6484_v10 = vpack.c.bf16 %v3346_v8, %v3345_v62  ;;  %v4118_v8 = vld [vmem:[%s7791_s1 + $0x550] sm:$0xff] }
 0x7e9   :  { %v2309_v4 = vadd.f32 %v2307_v43, %v2263_v7  ;;  %v3263_v7 = vld [vmem:[%s7791_s1 + $0x410] sm:$0xf]  ;;  %v3513_v43 = vld [vmem:[%s7791_s1 + $0x488] sm:$0xff] }
 0x7ea   :  { %v2316_v15 = vmul.f32 %v7097_v11, %v2312_v5 }
 0x7eb   :  { %v2311_v12 = vmax.f32 %v2309_v4, 0.0  ;;  %v3514_v4 = vld [vmem:[%s7791_s1 + $0x490] sm:$0xff] }
 0x7ed   :  { %v2315_v14 = vmul.f32 %v7097_v11, %v2311_v12  ;;  %v2401_v11 = vld [vmem:[%s7791_s1 + $0x368] sm:$0xff] }
 0x7ef   :  { %6135 = vmatprep.mubr.msk.f32.mxu0 %vm426_vm4, %v2315_v14  ;;  %v3430_v14 = vld [vmem:[%s7791_s1 + $0x418] sm:$0xff] }
 0x7f0   :  { %6136 = vmatmul.mubr.msk.f32.vlgmr.msra.gmra.mrb[36].mxu0 %vm426_vm4, %v2316_v15  ;;  %v6494_v15 = vpack.c.bf16 %v3514_v4, %v3513_v43  ;;  %v4288_v43 = vld [vmem:[%s7791_s1 + $0x570] sm:$0xff]  ;;  %v4289_v4 = vld [vmem:[%s7791_s1 + $0x578] sm:$0xff] }
 0x7f1   :  { %6142 = vmatprep.mubr.msk.f32.mxu0 %vm6755_vm5, %v6756_v49 }
 0x8c3   :  { %v6137_v58 = vpop.f32.mrb[36].mxu0 }
 0x8c4   :  { %v2399_v48 = vadd.f32 %v6137_v58, %v2314_v57  ;;  %v2389_v16 = vpop.f32.mrb[37].mxu0  ;;  %v3697_v58 = vld [vmem:[%s7791_s1 + $0x500] sm:$0xff] }
 0x8c5   :  { %v2398_v17 = vadd.f32 %v2389_v16, %v2313_v46  ;;  %v3698_v46 = vld [vmem:[%s7791_s1 + $0x508] sm:$0xff] }
 0x8c6   :  { %v6504_v16 = vpack.c.bf16 %v3698_v46, %v3697_v58 }
 0x8c7   :  { %v6432_v18 = vpack.c.bf16 %v2399_v48, %v2398_v17  ;;  %v3699_v48 = vld [vmem:[%s7791_s1 + $0x510] sm:$0xff]  ;;  %v3700_v17 = vld [vmem:[%s7791_s1 + $0x518] sm:$0xff] }
 0x8c8   :  { %6505 = vmatprep.subr.bf16.mxu1 %v6504_v16 }
 0x8c9   :  { %6433 = vmatpush3.bf16.msra.mxu0 %v6432_v18  ;;  %v6508_v18 = vpack.c.bf16 %v3700_v17, %v3699_v48  ;;  %6507 = vmatpush3.bf16.msra.mxu1 %v6504_v16  ;;  %v4384_v48 = vld [vmem:[%s7791_s1 + $0x590] sm:$0xf]  ;;  %v4382_v17 = vld [vmem:[%s7791_s1 + $0x5c8] sm:$0xff] }
 0x8ca   :  { %6436 = vmatprep.subr.msk.bf16.mxu0 %vm6780_vm3, %v6784_v3  ;;  %v4469_v16 = vld [vmem:[%s7791_s1 + $0x5d0] sm:$0xff] }
 0x8cb   :  { %6509 = vmatprep.subr.bf16.mxu1 %v6508_v18 }
 0x8cc   :  { %6143 = vmatmul.mubr.msk.f32.vlgmr.msra.gmra.mrb[38].mxu0 %vm426_vm4, %v2400_v19  ;;  %v5505_v19 = vld [vmem:[%s7791_s1 + $0x498] ss:$0 sm:$0xff] }
 0x8cd   :  { %6145 = vmatprep.mubr.msk.f32.mxu0 %vm6755_vm5, %v6756_v49  ;;  %6439 = vmatpush3.bf16.msk.msra.mxu0 %vm6780_vm3, %v6784_v3 }
 0x8ce   :  { %6511 = vmatpush3.bf16.msra.mxu1 %v6508_v18 }
 0x8d0   :  { %6146 = vmatmul.mubr.msk.f32.gmra.mrb[40].mxu0 %vm426_vm4, %v2401_v11 }
 0x8d1   :  { %6148 = vmatprep.mubr.msk.f32.mxu0 %vm6755_vm5, %v6756_v49  ;;  %v2595_v49 = vld [vmem:[%s7791_s1 + $0x438] sm:$0xff] }
 0x8d2   :  { %v6440_v24 = vpack.c.bf16 %v2596_v23, %v2595_v49 }
 0x8d4   :  { %6149 = vmatmul.mubr.msk.f32.gmra.mrb[42].mxu0 %vm426_vm4, %v2402_v20  ;;  %6441 = vmatprep.subr.bf16.mxu0 %v6440_v24 }
 0x8d5   :  { %6155 = vmatprep.mubr.msk.f32.mxu0 %vm68_vm1, %v2512_v21 }
 0x8d8   :  { %6156 = vmatmul.mubr.msk.f32.vlgmr.msra.gmra.mrb[44].mxu0 %vm68_vm1, %v2513_v22 }
 0x8d9   :  { %6443 = vmatpush3.bf16.msra.mxu0 %v6440_v24 }
 0x8da   :  { %6445 = vmatprep.subr.bf16.mxu0 %v6444_v27 }
 0x99f   :  { %v7421_v28 = vpop.f32.mrb[38].mxu0 }
 0x9a0   :  { %v6144_v29 = vpop.f32.mrb[39].mxu0 }
 0x9a1   :  { %v4033_v29 = vld [vmem:[%s7791_s1 + $0x4c0] sm:$0xff] }
 0x9a3   :  { %v7423_v30 = vpop.f32.mrb[40].mxu0 }
 0x9a4   :  { %v6147_v31 = vpop.f32.mrb[41].mxu0 }
 0x9a5   :  { %v4034_v31 = vld [vmem:[%s7791_s1 + $0x4c8] sm:$0xf] }
 0x9a7   :  { %v7425_v45 = vpop.f32.mrb[42].mxu0 }
 0x9a8   :  { %v6150_v32 = vpop.f32.mrb[43].mxu0 }
 0x9a9   :  { %v4203_v32 = vld [vmem:[%s7791_s1 + $0x4d0] sm:$0xff] }
 0x9ab   :  { %v6157_v33 = vpop.f32.mrb[44].mxu0 }
 0x9ac   :  { %v2586_v34 = vpop.f32.mrb[45].mxu0 }
 0x9ad   :  { %6162 = vmatprep.mubr.msk.f32.mxu0 %vm426_vm4, %v2586_v34  ;;  %v3607_v34 = vld [vmem:[%s7791_s1 + $0x4e0] sm:$0xff] }
 0x9ae   :  { %6163 = vmatmul.mubr.msk.f32.vlgmr.msra.gmra.mrb[46].mxu0 %vm426_vm4, %v6157_v33  ;;  %v4204_v33 = vld [vmem:[%s7791_s1 + $0x4d8] sm:$0xf] }
 0x9af   :  { %6447 = vmatpush3.bf16.msra.mxu0 %v6444_v27  ;;  %6169 = vmatprep.mubr.msk.f32.mxu0 %vm426_vm4, %v6750_v35  ;;  %v3864_v27 = vld [vmem:[%s7791_s1 + $0x4b8] sm:$0xf]  ;;  %v3608_v35 = vld [vmem:[%s7791_s1 + $0x4e8] sm:$0xff] }
 0x9b0   :  { %6450 = vmatprep.subr.msk.bf16.mxu0 %vm6780_vm3, %v6784_v3  ;;  %v6512_v36 = vpack.c.bf16 %v3608_v35, %v3607_v34 }
 0x9b2   :  { %6513 = vmatprep.subr.bf16.mxu1 %v6512_v36 }
 0x9b6   :  { %6170 = vmatmul.mubr.msk.f32.vlgmr.msra.gmra.mrb[46].mxu0 %vm426_vm4, %v6751_v40 }
 0x9b7   :  { %6453 = vmatpush3.bf16.msk.msra.mxu0 %vm6780_vm3, %v6784_v3  ;;  %6176 = vmatprep.mubr.msk.f32.mxu0 %vm68_vm1, %v2758_v38  ;;  %v3610_v38 = vld [vmem:[%s7791_s1 + $0x4f8] sm:$0xff] }
 0x9b8   :  { %6455 = vmatprep.subr.bf16.mxu0 %v6454_v39 }
 0x9ba   :  { %6177 = vmatmul.mubr.msk.f32.vlgmr.msra.gmra.mrb[48].mxu0 %vm68_vm1, %v2759_v41  ;;  %v6516_v41 = vpack.c.bf16 %v3610_v38, %v3609_v37  ;;  %v5144_v37 = vld [vmem:[%s7791_s1 + $0x608] sm:$0xff]  ;;  %v5145_v38 = vld [vmem:[%s7791_s1 + $0x610] sm:$0xff] }
 0x9bb   :  { %6457 = vmatpush3.bf16.msra.mxu0 %v6454_v39 }
 0x9bc   :  { %6460 = vmatprep.subr.msk.bf16.mxu0 %vm6780_vm3, %v6784_v3 }
 0xa8d   :  { %v6178_v52 = vpop.f32.mrb[48].mxu0 }
 0xa8e   :  { %v2832_v53 = vpop.f32.mrb[49].mxu0 }
 0xa8f   :  { %6183 = vmatprep.mubr.msk.f32.mxu0 %vm426_vm4, %v2832_v53  ;;  %v6526_v53 = vpack.c.bf16 %v3947_v47, %v3946_v44 }
 0xa90   :  { %6184 = vmatmul.mubr.msk.f32.vlgmr.msra.gmra.mrb[46].mxu0 %vm426_vm4, %v6178_v52 }
 0xa91   :  { %6463 = vmatpush3.bf16.msk.msra.mxu0 %vm6780_vm3, %v6784_v3  ;;  %6190 = vmatprep.mubr.msk.f32.mxu0 %vm68_vm1, %v2926_v54 }
 0xa92   :  { %6465 = vmatprep.subr.bf16.mxu0 %v6464_v42 }
 0xa94   :  { %6191 = vmatmul.mubr.msk.f32.vlgmr.msra.gmra.mrb[50].mxu0 %vm68_vm1, %v2927_v61  ;;  %v3949_v61 = vld [vmem:[%s7791_s1 + $0x538] sm:$0xff] }
 0xa95   :  { %6467 = vmatpush3.bf16.msra.mxu0 %v6464_v42  ;;  %v3948_v42 = vld [vmem:[%s7791_s1 + $0x530] sm:$0xff] }
 0xa96   :  { %6470 = vmatprep.subr.msk.bf16.mxu0 %vm6780_vm3, %v6784_v3  ;;  %v6530_v50 = vpack.c.bf16 %v3949_v61, %v3948_v42  ;;  %v2414_v42 = vpop.permute.xlu1 %2413 }
 0xa97   :  { %v7762_v61 = vadd.f32 %v7423_v30, %v2414_v42 }
 0xb67   :  { %v6192_v0 = vpop.f32.mrb[50].mxu0 }
 0xb68   :  { %v3000_v51 = vpop.f32.mrb[51].mxu0 }
 0xb69   :  { %6197 = vmatprep.mubr.msk.f32.mxu0 %vm426_vm4, %v3000_v51  ;;  %v4116_v51 = vld [vmem:[%s7791_s1 + $0x540] sm:$0xff] }
 0xb6a   :  { %6198 = vmatmul.mubr.msk.f32.vlgmr.msra.gmra.mrb[46].mxu0 %vm426_vm4, %v6192_v0 }
 0xb6b   :  { %6473 = vmatpush3.bf16.msk.msra.mxu0 %vm6780_vm3, %v6784_v3  ;;  %6204 = vmatprep.mubr.msk.f32.mxu0 %vm68_vm1, %v3094_v1  ;;  %v4117_v1 = vld [vmem:[%s7791_s1 + $0x548] sm:$0xff] }
 0xb6c   :  { %6475 = vmatprep.subr.bf16.mxu0 %v6474_v60 }
 0xb6e   :  { %6205 = vmatmul.mubr.msk.f32.vlgmr.msra.gmra.mrb[52].mxu0 %vm68_vm1, %v3095_v59  ;;  %v6540_v59 = vpack.c.bf16 %v4117_v1, %v4116_v51 }
 0xb6f   :  { %6477 = vmatpush3.bf16.msra.mxu0 %v6474_v60 }
 0xb70   :  { %6480 = vmatprep.subr.msk.bf16.mxu0 %vm6780_vm3, %v6784_v3 }
 0xc41   :  { %v6206_v13 = vpop.f32.mrb[52].mxu0 }
 0xc42   :  { %v3168_v9 = vpop.f32.mrb[53].mxu0 }
 0xc43   :  { %6211 = vmatprep.mubr.msk.f32.mxu0 %vm426_vm4, %v3168_v9 }
 0xc44   :  { %6212 = vmatmul.mubr.msk.f32.vlgmr.msra.gmra.mrb[46].mxu0 %vm426_vm4, %v6206_v13  ;;  %v4119_v13 = vld [vmem:[%s7791_s1 + $0x558] sm:$0xff] }
 0xc45   :  { %6483 = vmatpush3.bf16.msk.msra.mxu0 %vm6780_vm3, %v6784_v3  ;;  %6218 = vmatprep.mubr.msk.f32.mxu0 %vm68_vm1, %v3262_v6  ;;  %v6544_v9 = vpack.c.bf16 %v4119_v13, %v4118_v8  ;;  %v4286_v6 = vld [vmem:[%s7791_s1 + $0x560] sm:$0xff] }
 0xc46   :  { %6485 = vmatprep.subr.bf16.mxu0 %v6484_v10 }
 0xc48   :  { %6219 = vmatmul.mubr.msk.f32.vlgmr.msra.gmra.mrb[54].mxu0 %vm68_vm1, %v3263_v7 }
 0xc49   :  { %6487 = vmatpush3.bf16.msra.mxu0 %v6484_v10  ;;  %v4287_v10 = vld [vmem:[%s7791_s1 + $0x568] sm:$0xff] }
 0xc4a   :  { %6490 = vmatprep.subr.msk.bf16.mxu0 %vm6780_vm3, %v6784_v3  ;;  %v6554_v7 = vpack.c.bf16 %v4287_v10, %v4286_v6 }
 0xd1b   :  { %v6220_v5 = vpop.f32.mrb[54].mxu0 }
 0xd1c   :  { %v3336_v12 = vpop.f32.mrb[55].mxu0 }
 0xd1d   :  { %6225 = vmatprep.mubr.msk.f32.mxu0 %vm426_vm4, %v3336_v12  ;;  %v4383_v12 = vld [vmem:[%s7791_s1 + $0x588] sm:$0xff] }
 0xd1e   :  { %6226 = vmatmul.mubr.msk.f32.vlgmr.msra.gmra.mrb[46].mxu0 %vm426_vm4, %v6220_v5  ;;  %v6558_v5 = vpack.c.bf16 %v4289_v4, %v4288_v43 }
 0xd1f   :  { %6493 = vmatpush3.bf16.msk.msra.mxu0 %vm6780_vm3, %v6784_v3  ;;  %6232 = vmatprep.mubr.msk.f32.mxu0 %vm68_vm1, %v3430_v14  ;;  %v3611_v3 = vld [vmem:[%s7791_s1 + $0x4a0] sm:$0xff] }
 0xd20   :  { %6495 = vmatprep.subr.bf16.mxu0 %v6494_v15  ;;  %v5528_v14 = vld [vmem:[%s7791_s1 + $0x580] ss:$0 sm:$0xff] }
 0xd22   :  { %6233 = vmatmul.mubr.msk.f32.vlgmr.msra.gmra.mrb[56].mxu0 %vm68_vm1, %v3431_v55 }
 0xd23   :  { %6497 = vmatpush3.bf16.msra.mxu0 %v6494_v15 }
 0xdf5   :  { %v6234_v56 = vpop.f32.mrb[56].mxu0 }
 0xdf6   :  { %v3504_v57 = vpop.f32.mrb[57].mxu0 }
 0xdf7   :  { %6239 = vmatprep.mubr.msk.f32.mxu0 %vm426_vm4, %v3504_v57 }
 0xdf8   :  { %6240 = vmatmul.mubr.msk.f32.vlgmr.msra.gmra.mrb[46].mxu0 %vm426_vm4, %v6234_v56 }
 0xdf9   :  { %6246 = vmatprep.mubr.msk.f32.mxu0 %vm68_vm1, %v3611_v3 }
 0xecb   :  { %v6241_v11 = vpop.f32.mrb[46].mxu0 }
 0xecc   :  { %v3604_v20 = vadd.f32 %v6241_v11, %v5505_v19  ;;  %v3587_v21 = vpop.f32.mrb[47].mxu0  ;;  %v4632_v11 = vld [vmem:[%s7791_s1 + $0x598] sm:$0xff] }
 0xecd   :  { %v3603_v22 = vadd.f32 %v5505_v19, %v3587_v21  ;;  %v4633_v21 = vld [vmem:[%s7791_s1 + $0x5a0] sm:$0xf] }
 0xece   :  { %v3606_v49 = vmax.f32 %v3604_v20, 0.0  ;;  %v4715_v20 = vld [vmem:[%s7791_s1 + $0x5d8] sm:$0xff] }
 0xecf   :  { %v3605_v23 = vmax.f32 %v3603_v22, 0.0  ;;  %v4966_v22 = vld [vmem:[%s7791_s1 + $0x5b8] sm:$0xff] }
 0xed1   :  { %v6498_v24 = vpack.c.bf16 %v3606_v49, %v3605_v23 }
 0xed3   :  { %6500 = vmatprep.subr.msk.bf16.mxu0 %vm6780_vm3, %v6498_v24 }
 0xed4   :  { %6503 = vmatpush3.bf16.msk.msra.mxu0 %vm6780_vm3, %v6498_v24 }
 0xed5   :  { %6522 = vmatprep.subr.msk.bf16.mxu0 %vm6780_vm3, %v6498_v24 }
 0xed7   :  { %6247 = vmatmul.mubr.msk.f32.vlgmr.msra.gmra.mrb[58].mxu0 %vm68_vm1, %v3612_v25  ;;  %v4799_v25 = vld [vmem:[%s7791_s1 + $0x5a8] sm:$0xff] }
 0xed8   :  { %6525 = vmatpush3.bf16.msk.msra.mxu0 %vm6780_vm3, %v6498_v24  ;;  %6275 = vmatprep.mubr.msk.f32.mxu0 %vm68_vm1, %v3863_v26  ;;  %v4800_v26 = vld [vmem:[%s7791_s1 + $0x5b0] sm:$0xf] }
 0xed9   :  { %6536 = vmatprep.subr.msk.bf16.mxu0 %vm6780_vm3, %v6498_v24 }
 0xedb   :  { %6276 = vmatmul.mubr.msk.f32.vlgmr.msra.gmra.mrb[60].mxu0 %vm68_vm1, %v3864_v27  ;;  %v4882_v27 = vld [vmem:[%s7791_s1 + $0x5e0] sm:$0xff] }
 0xedc   :  { %6539 = vmatpush3.bf16.msk.msra.mxu0 %vm6780_vm3, %v6498_v24  ;;  %6293 = vmatprep.mubr.msk.f32.mxu0 %vm68_vm1, %v4033_v29  ;;  %v5049_v29 = vld [vmem:[%s7791_s1 + $0x5e8] sm:$0xff] }
 0xedd   :  { %6550 = vmatprep.subr.msk.bf16.mxu0 %vm6780_vm3, %v6498_v24 }
 0xedf   :  { %6294 = vmatmul.mubr.msk.f32.vlgmr.msra.gmra.mrb[62].mxu0 %vm68_vm1, %v4034_v31 }
 0xee0   :  { %6553 = vmatpush3.bf16.msk.msra.mxu0 %vm6780_vm3, %v6498_v24  ;;  %6311 = vmatprep.mubr.msk.f32.mxu0 %vm68_vm1, %v4203_v32  ;;  %v5142_v32 = vld [vmem:[%s7791_s1 + $0x5f8] sm:$0xff] }
 0xee3   :  { %6312 = vmatmul.mubr.msk.f32.vlgmr.msra.gmra.mrb[64].mxu0 %vm68_vm1, %v4204_v33  ;;  %v5143_v33 = vld [vmem:[%s7791_s1 + $0x600] sm:$0xff] }
 0xee4   :  { %6329 = vmatprep.mubr.msk.f32.mxu0 %vm68_vm1, %v4383_v12  ;;  %v6586_v34 = vpack.c.bf16 %v5143_v33, %v5142_v32 }
 0xfaa   :  { %v6248_v39 = vpop.f32.mrb[58].mxu0 }
 0xfab   :  { %v3688_v40 = vpop.f32.mrb[59].mxu0 }
 0xfac   :  { %6257 = vmatprep.mubr.msk.f32.mxu1 %vm3701_vm7, %v3688_v40  ;;  %v5551_v40 = vld [vmem:[%s7791_s1 + $0x5f0] ss:$0 sm:$0xff] }
 0xfad   :  { %6258 = vmatmul.mubr.msk.f32.vlgmr.msra.gmra.mrb[70].mxu1 %vm3701_vm7, %v6248_v39  ;;  %v6590_v39 = vpack.c.bf16 %v5145_v38, %v5144_v37 }
 0xfae   :  { %6515 = vmatpush3.bf16.msra.mxu1 %v6512_v36  ;;  %6268 = vmatprep.mubr.msk.f32.mxu1 %vm3701_vm7, %v3605_v23  ;;  %v6277_v52 = vpop.f32.mrb[60].mxu0 }
 0xfaf   :  { %6517 = vmatprep.subr.bf16.mxu1 %v6516_v41  ;;  %v3937_v54 = vpop.f32.mrb[61].mxu0 }
 0xfb2   :  { %6519 = vmatpush3.bf16.msra.mxu1 %v6516_v41  ;;  %v6295_v63 = vpop.f32.mrb[62].mxu0 }
 0xfb3   :  { %6527 = vmatprep.subr.bf16.mxu1 %v6526_v53  ;;  %v4107_v0 = vpop.f32.mrb[63].mxu0 }
 0xfb5   :  { %6269 = vmatmul.mubr.msk.f32.vlgmr.msra.gmra.mrb[70].mxu1 %vm3701_vm7, %v3606_v49  ;;  %v4967_v49 = vld [vmem:[%s7791_s1 + $0x5c0] sm:$0xf] }
 0xfb6   :  { %6529 = vmatpush3.bf16.msra.mxu1 %v6526_v53  ;;  %6286 = vmatprep.mubr.msk.f32.mxu1 %vm3701_vm7, %v3937_v54  ;;  %v6313_v60 = vpop.f32.mrb[64].mxu0 }
 0xfb7   :  { %6531 = vmatprep.subr.bf16.mxu1 %v6530_v50  ;;  %v4277_v62 = vpop.f32.mrb[65].mxu0 }
 0xfba   :  { %6533 = vmatpush3.bf16.msra.mxu1 %v6530_v50 }
 0xfbb   :  { %6541 = vmatprep.subr.bf16.mxu1 %v6540_v59 }
 0xfbd   :  { %6287 = vmatmul.mubr.msk.f32.vlgmr.msra.gmra.mrb[70].mxu1 %vm3701_vm7, %v6277_v52 }
 0xfbe   :  { %6543 = vmatpush3.bf16.msra.mxu1 %v6540_v59  ;;  %6304 = vmatprep.mubr.msk.f32.mxu1 %vm3701_vm7, %v4107_v0  ;;  %v5235_v0 = vand.u32 2147483647, %v7762_v61 }
 0xfbf   :  { %6545 = vmatprep.subr.bf16.mxu1 %v6544_v9 }
 0xfc0   :  { %v5237_v1 = vsub.f32 0.0, %v5235_v0 }
 0xfc2   :  { %6547 = vmatpush3.bf16.msra.mxu1 %v6544_v9  ;;  %v5240_v59 = vmul.f32 1.442695, %v5237_v1  ;;  %v2419_v1 = vpop.permute.xlu0 %2418 }
 0xfc3   :  { %6555 = vmatprep.subr.bf16.mxu1 %v6554_v7 }
 0xfc4   :  { %6718 = vpow2.f32 %v5240_v59  ;;  %v5270_v59 = vmax.f32 %v7762_v61, -30.0 }
 0xfc5   :  { %6305 = vmatmul.mubr.msk.f32.vlgmr.msra.gmra.mrb[70].mxu1 %vm3701_vm7, %v6295_v63  ;;  %v2409_v63 = vpop.permute.xlu1 %2408 }
 0xfc6   :  { %6557 = vmatpush3.bf16.msra.mxu1 %v6554_v7  ;;  %6322 = vmatprep.mubr.msk.f32.mxu1 %vm3701_vm7, %v4277_v62  ;;  %v7765_v50 = vadd.f32 %v7421_v28, %v2409_v63  ;;  %v5552_v62 = vld [vmem:[%s7791_s1 + $0x618] ss:$0 sm:$0xff] }
 0xfc7   :  { %6559 = vmatprep.subr.bf16.mxu1 %v6558_v5 }
 0xfc8   :  { %v5234_v51 = vand.u32 2147483647, %v7765_v50  ;;  %v5232_v33 = vmax.f32 %v7765_v50, 0.0 }
 0xfca   :  { %6561 = vmatpush3.bf16.msra.mxu1 %v6558_v5 }
 0xfcd   :  { %6323 = vmatmul.mubr.msk.f32.vlgmr.msra.gmra.mrb[70].mxu1 %vm3701_vm7, %v6313_v60  ;;  %v5236_v60 = vsub.f32 0.0, %v5234_v51 }
 0xfce   :  { %6370 = vmatprep.mubr.msk.f32.mxu1 %vm68_vm1, %v4966_v22 }
 0xfcf   :  { %v5238_v8 = vmul.f32 1.442695, %v5236_v60  ;;  %v2507_v60 = vadd.f32 %v7425_v45, %v2419_v1 }
 0xfd1   :  { %6720 = vpow2.f32 %v5238_v8  ;;  %v5272_v8 = vsub.f32 0.0, %v5270_v59 }
0x10a0   :  { %v6324_v15 = vpop.f32.mrb[70].mxu1 }
0x10a1   :  { %v4379_v55 = vadd.f32 %v6324_v15, %v5528_v14  ;;  %v4362_v56 = vpop.f32.mrb[71].mxu1 }
0x10a2   :  { %v4378_v57 = vadd.f32 %v5528_v14, %v4362_v56 }
0x10a3   :  { %v4381_v3 = vmax.f32 %v4379_v55, 0.0 }
0x10a4   :  { %v4380_v58 = vmax.f32 %v4378_v57, 0.0 }
0x10a6   :  { %v6562_v46 = vpack.c.bf16 %v4381_v3, %v4380_v58 }
0x10a8   :  { %6564 = vmatprep.subr.msk.bf16.mxu0 %vm6780_vm3, %v6562_v46  ;;  %6582 = vmatprep.subr.msk.bf16.mxu1 %vm6780_vm3, %v6562_v46 }
0x10a9   :  { %6567 = vmatpush3.bf16.msk.msra.mxu0 %vm6780_vm3, %v6562_v46  ;;  %6585 = vmatpush3.bf16.msk.msra.mxu1 %vm6780_vm3, %v6562_v46 }
0x10aa   :  { %6332 = vmatprep.subr.mxu0 %v4469_v16  ;;  %6587 = vmatprep.subr.bf16.mxu1 %v6586_v34 }
0x10ac   :  { %6330 = vmatmul.mubr.msk.f32.vlgmr.msra.gmra.mrb[66].mxu0 %vm68_vm1, %v4384_v48  ;;  %6371 = vmatmul.mubr.msk.f32.vlgmr.msra.gmra.mrb[72].mxu1 %vm68_vm1, %v4967_v49 }
0x10ad   :  { %6333 = vmatpush3.msra.mxu0 %v4469_v16  ;;  %6589 = vmatpush3.bf16.msra.mxu1 %v6586_v34 }
0x10ae   :  { %6337 = vmatprep.subr.mxu0 %v4382_v17  ;;  %6591 = vmatprep.subr.bf16.mxu1 %v6590_v39 }
0x10b1   :  { %6593 = vmatpush3.bf16.msra.mxu1 %v6590_v39 }
0x117f   :  { %v6331_v18 = vpop.f32.mrb[66].mxu0  ;;  %v6372_v2 = vpop.f32.mrb[72].mxu1 }
0x1180   :  { %v4460_v19 = vpop.f32.mrb[67].mxu0  ;;  %v5040_v31 = vpop.f32.mrb[73].mxu1 }
0x1181   :  { %6334 = vmatprep.mubr.msk.f32.mxu0 %vm4470_vm8, %v4460_v19 }
0x1182   :  { %6335 = vmatmul.mubr.msk.f32.vlgmr.msra.gmra.mrb[68].mxu0 %vm4470_vm8, %v6331_v18 }
0x1183   :  { %6338 = vmatpush3.msra.mxu0 %v4382_v17  ;;  %6339 = vmatprep.mubr.msk.f32.mxu0 %vm4470_vm8, %v4380_v58 }
0x1184   :  { %6570 = vmatprep.subr.msk.bf16.mxu0 %vm6780_vm3, %v6562_v46 }
0x118a   :  { %6340 = vmatmul.mubr.msk.f32.vlgmr.msra.gmra.mrb[68].mxu0 %vm4470_vm8, %v4381_v3  ;;  %v6719_v3 = vpop.eup %6718 }
0x118b   :  { %6573 = vmatpush3.bf16.msk.msra.mxu0 %vm6780_vm3, %v6562_v46  ;;  %6346 = vmatprep.mubr.msk.f32.mxu0 %vm68_vm1, %v4632_v11  ;;  %v6721_v58 = vpop.eup %6720 }
0x118c   :  { %6349 = vmatprep.subr.mxu0 %v4715_v20  ;;  %v5242_v48 = vadd.f32 1.0, %v6721_v58 }
0x118e   :  { %6347 = vmatmul.mubr.msk.f32.vlgmr.msra.gmra.mrb[70].mxu0 %vm68_vm1, %v4633_v21 }
0x118f   :  { %6350 = vmatpush3.msra.mxu0 %v4715_v20 }
0x1190   :  { %6576 = vmatprep.subr.msk.bf16.mxu0 %vm6780_vm3, %v6562_v46 }
0x1261   :  { %v6348_v23 = vpop.f32.mrb[70].mxu0 }
0x1262   :  { %v4706_v24 = vpop.f32.mrb[71].mxu0 }
0x1263   :  { %6351 = vmatprep.mubr.msk.f32.mxu0 %vm4470_vm8, %v4706_v24 }
0x1264   :  { %6352 = vmatmul.mubr.msk.f32.vlgmr.msra.gmra.mrb[68].mxu0 %vm4470_vm8, %v6348_v23 }
0x1265   :  { %6579 = vmatpush3.bf16.msk.msra.mxu0 %vm6780_vm3, %v6562_v46  ;;  %6358 = vmatprep.mubr.msk.f32.mxu0 %vm68_vm1, %v4799_v25  ;;  %v5243_v46 = vadd.f32 1.0, %v6719_v3 }
0x1266   :  { %6361 = vmatprep.subr.mxu0 %v4882_v27 }
0x1268   :  { %6359 = vmatmul.mubr.msk.f32.vlgmr.msra.gmra.mrb[72].mxu0 %vm68_vm1, %v4800_v26 }
0x1269   :  { %6362 = vmatpush3.msra.mxu0 %v4882_v27 }
0x126a   :  { %6373 = vmatprep.subr.mxu0 %v5049_v29 }
0x133b   :  { %v6360_v35 = vpop.f32.mrb[72].mxu0 }
0x133c   :  { %v4873_v36 = vpop.f32.mrb[73].mxu0 }
0x133d   :  { %6363 = vmatprep.mubr.msk.f32.mxu0 %vm4470_vm8, %v4873_v36 }
0x133e   :  { %6364 = vmatmul.mubr.msk.f32.vlgmr.msra.gmra.mrb[68].mxu0 %vm4470_vm8, %v6360_v35 }
0x133f   :  { %6374 = vmatpush3.msra.mxu0 %v5049_v29  ;;  %6375 = vmatprep.mubr.msk.f32.mxu0 %vm4470_vm8, %v5040_v31  ;;  %v5233_v29 = vmax.f32 %v7762_v61, 0.0 }
0x1346   :  { %6376 = vmatmul.mubr.msk.f32.vlgmr.msra.gmra.mrb[68].mxu0 %vm4470_vm8, %v6372_v2 }
0x1419   :  { %v6377_v41 = vpop.f32.mrb[68].mxu0 }
0x141a   :  { %v5139_v44 = vadd.f32 %v6377_v41, %v5551_v40  ;;  %v5122_v47 = vpop.f32.mrb[69].mxu0 }
0x141b   :  { %v5138_v52 = vadd.f32 %v5551_v40, %v5122_v47 }
0x141c   :  { %v5141_v54 = vmax.f32 %v5139_v44, 0.0 }
0x141d   :  { %v5140_v53 = vmax.f32 %v5138_v52, 0.0 }
0x141f   :  { %6386 = vmatprep.mubr.msk.f32.mxu1 %vm3701_vm7, %v5140_v53 }
0x1420   :  { %6387 = vmatmul.mubr.msk.f32.vlgmr.msra.gmra.mrb[74].mxu1 %vm3701_vm7, %v5141_v54 }
0x14f3   :  { %v6388_v13 = vpop.f32.mrb[74].mxu1 }
0x14f4   :  { %v5229_v30 = vadd.f32 %v6388_v13, %v5552_v62  ;;  %v5223_v9 = vpop.f32.mrb[75].mxu1 }
0x14f5   :  { %v5224_v6 = vadd.f32 %v5552_v62, %v5223_v9  ;;  %v5271_v62 = vmax.f32 %v2507_v60, -30.0 }
0x14f6   :  { %v5253_v28 = vand.u32 2147483647, %v5229_v30  ;;  %v5289_v10 = vmax.f32 %v5229_v30, -30.0  ;;  %v5251_v2 = vmax.f32 %v5229_v30, 0.0  ;;  %v5274_v30 = vmul.f32 1.442695, %v5272_v8 }
0x14f7   :  { %v5252_v7 = vand.u32 2147483647, %v5224_v6  ;;  %v5288_v43 = vmax.f32 %v5224_v6, -30.0  ;;  %v5250_v38 = vmax.f32 %v5224_v6, 0.0  ;;  %v5273_v13 = vsub.f32 0.0, %v5271_v62 }
0x14f8   :  { %v5255_v4 = vsub.f32 0.0, %v5253_v28  ;;  %v5291_v5 = vsub.f32 0.0, %v5289_v10 }
0x14f9   :  { %v5254_v12 = vsub.f32 0.0, %v5252_v7  ;;  %v5290_v14 = vsub.f32 0.0, %v5288_v43  ;;  %v5276_v9 = vmul.f32 1.442695, %v5273_v13 }
0x14fa   :  { %v5258_v15 = vmul.f32 1.442695, %v5255_v4  ;;  %v5294_v55 = vmul.f32 1.442695, %v5291_v5 }
0x14fb   :  { %v5256_v56 = vmul.f32 1.442695, %v5254_v12  ;;  %v5292_v57 = vmul.f32 1.442695, %v5290_v14 }
0x14fc   :  { %6722 = vpow2.f32 %v5258_v15 }
0x14fd   :  { %6724 = vpow2.f32 %v5294_v55 }
0x14fe   :  { %6726 = vpow2.f32 %v5256_v56 }
0x14ff   :  { %6728 = vpow2.f32 %v5292_v57 }
0x1500   :  { %6730 = vlog2.f32 %v5243_v46 }
0x1501   :  { %6732 = vlog2.f32 %v5242_v48 }
0x1506   :  { %v6723_v16 = vpop.eup %6722 }
0x1507   :  { %v6725_v17 = vpop.eup %6724  ;;  %v5261_v18 = vadd.f32 1.0, %v6723_v16 }
0x1508   :  { %v6727_v19 = vpop.eup %6726  ;;  %v5297_v11 = vadd.f32 1.0, %v6725_v17 }
0x1509   :  { %v6729_v20 = vpop.eup %6728  ;;  %6734 = vlog2.f32 %v5261_v18  ;;  %v5260_v21 = vadd.f32 1.0, %v6727_v19 }
0x150a   :  { %6736 = vrcp.f32 %v5297_v11  ;;  %v5296_v22 = vadd.f32 1.0, %v6729_v20  ;;  %v6731_v49 = vpop.eup %6730 }
0x150b   :  { %6738 = vlog2.f32 %v5260_v21  ;;  %v6733_v23 = vpop.eup %6732  ;;  %v5247_v24 = vmul.f32 0.6931472, %v6731_v49 }
0x150c   :  { %6740 = vrcp.f32 %v5296_v22  ;;  %v5245_v27 = vmul.f32 0.6931472, %v6733_v23 }
0x150d   :  { %v5249_v36 = vadd.f32 %v5247_v24, %v5233_v29  ;;  %6742 = vpow2.f32 %v5274_v30 }
0x150e   :  { %v5248_v44 = vadd.f32 %v5245_v27, %v5232_v33  ;;  %6744 = vpow2.f32 %v5276_v9 }
0x1513   :  { %v6735_v25 = vpop.eup %6734 }
0x1514   :  { %v6737_v26 = vpop.eup %6736  ;;  %v5265_v31 = vmul.f32 0.6931472, %v6735_v25 }
0x1515   :  { %v6739_v32 = vpop.eup %6738  ;;  %v5301_v34 = vmul.f32 %v6737_v26, %v5297_v11 }
0x1516   :  { %v6741_v35 = vpop.eup %6740  ;;  %v5267_v37 = vadd.f32 %v5265_v31, %v5251_v2  ;;  %v5263_v39 = vmul.f32 0.6931472, %v6739_v32 }
0x1517   :  { %v5300_v40 = vmul.f32 %v6741_v35, %v5296_v22  ;;  %v5303_v41 = vsub.f32 2.0, %v5301_v34  ;;  %v6743_v6 = vpop.eup %6742 }
0x1518   :  { %v5269_v47 = vmul.f32 %v5267_v37, %v5249_v36  ;;  %v5266_v52 = vadd.f32 %v5263_v39, %v5250_v38  ;;  %v6745_v28 = vpop.eup %6744  ;;  %v5278_v10 = vadd.f32 1.0, %v6743_v6 }
0x1519   :  { %v5302_v53 = vsub.f32 2.0, %v5300_v40  ;;  %v5305_v54 = vmul.f32 %v6737_v26, %v5303_v41  ;;  %v5279_v7 = vadd.f32 1.0, %v6745_v28 }
0x151a   :  { %v5268_v42 = vmul.f32 %v5266_v52, %v5248_v44  ;;  %6746 = vrcp.f32 %v5278_v10 }
0x151b   :  { %v5304_v63 = vmul.f32 %v6741_v35, %v5302_v53  ;;  %v5309_v0 = vrot.slane %v5305_v54, 4  ;;  %6748 = vrcp.f32 %v5279_v7 }
0x151c   :  { %5320 = vst.msk [vmem:[%s7792_s2] sm:$0xff] %vm426_vm4, %v5268_v42 }
0x151d   :  { %v5308_v50 = vrot.slane %v5304_v63, 4 }
0x151f   :  { %5311 = vrot.lane.b32.xlu0 %v5308_v50, %s6757_s13  ;;  %v5310_v51 = vsel %vm177_vm0, %v5308_v50, %v5309_v0 }
0x1520   :  { %5313 = vrot.lane.b32.xlu1 %v5310_v51, %s6757_s13 }
0x1524   :  { %v6747_v43 = vpop.eup %6746 }
0x1525   :  { %v6749_v4 = vpop.eup %6748  ;;  %v5282_v5 = vmul.f32 %v6747_v43, %v5278_v10 }
0x1526   :  { %v5283_v12 = vmul.f32 %v6749_v4, %v5279_v7 }
0x1527   :  { %v5284_v45 = vsub.f32 2.0, %v5282_v5 }
0x1528   :  { %v5285_v14 = vsub.f32 2.0, %v5283_v12 }
0x1529   :  { %v5286_v61 = vmul.f32 %v6747_v43, %v5284_v45 }
0x152a   :  { %v5287_v55 = vmul.f32 %v6749_v4, %v5285_v14 }
0x1591   :  { %v5312_v15 = vpop.permute.xlu0 %5311 }
0x1592   :  { %v5317_v56 = vmul.f32 %v5312_v15, %v5286_v61  ;;  %v5314_v57 = vpop.permute.xlu1 %5313 }
0x1593   :  { %v5318_v3 = vmul.f32 %v5314_v57, %v5287_v55 }
0x1594   :  { %v5319_v58 = vsel %vm177_vm0, %v5269_v47, %v5317_v56 }
0x1595   :  { %5321 = vst.msk [vmem:[%s7792_s2 + $0x8] sm:$0xff] %vm426_vm4, %v5319_v58  ;;  %5322 = vst.msk [vmem:[%s7792_s2 + $0x10] sm:$0xff] %vm426_vm4, %v5318_v3 }

</bundles_post_ra>
